<compile_context>
chip_gen: v7x
topology: tpu7x:2x2x1
jax: 0.10.0
libtpu: 0.0.40
codegen_flags: <defaults>
</compile_context>

<pallas_src>
import jax
import jax.numpy as jnp
from jax.experimental import pallas as pl
from jax.experimental.pallas import tpu as pltpu


def _f0_lstm_fc_kernel(x_ref, len_ref, wih_ref, whh_ref, b_ref,
                       w1_ref, b1_ref, w2_ref, b2_ref,
                       out_ref, hbuf):
    """Whole forward in one invocation: unrolled LSTM + batched FC head."""
    B, T, D = x_ref.shape
    H = whh_ref.shape[0]

    # ---- Hoisted input projection: one (B*T, D) @ (D, 4H) matmul + bias. ----
    x_flat = x_ref[...].reshape(B * T, D)                       # batch-major
    x_proj = (jnp.dot(x_flat, wih_ref[...],
                      preferred_element_type=jnp.float32)
              + b_ref[...])                                     # (B*T, 4H)
    x_proj = x_proj.reshape(B, T, 4 * H)

    lengths = len_ref[...]                                      # (B, 1) int32

    h = jnp.zeros((B, H), jnp.float32)
    c = jnp.zeros((B, H), jnp.float32)

    # ---- Serial recurrence, fully unrolled (static T). Only the hidden
    #      matmul + gate nonlinearities sit on the dependency chain. ----
    for t in range(T):
        gates = x_proj[:, t, :] + jnp.dot(
            h, whh_ref[...], preferred_element_type=jnp.float32)  # (B, 4H)

        # PyTorch LSTM gate ordering: i, f, g, o
        i_g = jax.nn.sigmoid(gates[:, 0 * H:1 * H])
        f_g = jax.nn.sigmoid(gates[:, 1 * H:2 * H])
        g_g = jnp.tanh(gates[:, 2 * H:3 * H])
        o_g = jax.nn.sigmoid(gates[:, 3 * H:4 * H])

        c_new = f_g * c + i_g * g_g
        h_new = o_g * jnp.tanh(c_new)

        valid = lengths > t                                     # (B, 1) bool
        # Packed-sequence semantics: state frozen past each sequence length.
        h = jnp.where(valid, h_new, h)
        c = jnp.where(valid, c_new, c)
        # pad_packed_sequence(padding_value=0.0): padded positions emit zeros.
        hbuf[:, t:t + 1, :] = jnp.where(valid, h_new, 0.0)[:, None, :]

    # ---- FC head hoisted out of the recurrence: one batched matmul. ----
    lstm_out = hbuf[...].reshape(B * T, H)                      # (B*T, H)
    hid = jnp.maximum(
        jnp.dot(lstm_out, w1_ref[...], preferred_element_type=jnp.float32)
        + b1_ref[...], 0.0)                                     # (B*T, 128)
    # fc2 (128 -> 1) on VPU/XLU: elementwise mul + lane reduce (MXU stays free).
    logits = jnp.sum(hid * w2_ref[...], axis=-1, keepdims=True) + b2_ref[...]
    out_ref[...] = logits                                       # (B*T, 1)


def f0cnnae_forward(inputs, input_lengths, params):
    """inputs: (B, T, D) float32, input_lengths: (B,) int32.  Returns (B, T)."""
    B, T, D = inputs.shape
    H = params["whh_t"].shape[0]
    lengths = input_lengths.astype(jnp.int32).reshape(B, 1)

    out_flat = pl.pallas_call(
        _f0_lstm_fc_kernel,
        out_shape=jax.ShapeDtypeStruct((B * T, 1), jnp.float32),
        scratch_shapes=[pltpu.VMEM((B, T, H), jnp.float32)],    # masked h stage
    )(inputs, lengths,
      params["wih_t"], params["whh_t"], params["b"],
      params["w1_t"], params["b1"], params["w2_row"], params["b2"])

    # Batch-major flat (b*T + t) -> (B, T): metadata-only reshape, no HBM pass.
    return out_flat.reshape(B, T)


def f0cnnae_forward_ref(inputs, input_lengths, params):
    """Pure-JAX reference (no Pallas) for numerical verification."""
    B, T, D = inputs.shape
    H = params["whh_t"].shape[0]
    h = jnp.zeros((B, H), jnp.float32)
    c = jnp.zeros((B, H), jnp.float32)
    lengths = input_lengths.astype(jnp.int32).reshape(B, 1)
    outs = []
    for t in range(T):
        x_t = inputs[:, t, :]
        gates = x_t @ params["wih_t"] + h @ params["whh_t"] + params["b"]
        i_g = jax.nn.sigmoid(gates[:, 0 * H:1 * H])
        f_g = jax.nn.sigmoid(gates[:, 1 * H:2 * H])
        g_g = jnp.tanh(gates[:, 2 * H:3 * H])
        o_g = jax.nn.sigmoid(gates[:, 3 * H:4 * H])
        c_new = f_g * c + i_g * g_g
        h_new = o_g * jnp.tanh(c_new)
        valid = lengths > t
        h = jnp.where(valid, h_new, h)
        c = jnp.where(valid, c_new, c)
        lstm_out = jnp.where(valid, h_new, 0.0)
        hid = jnp.maximum(lstm_out @ params["w1_t"] + params["b1"], 0.0)
        outs.append(jnp.sum(hid * params["w2_row"], axis=-1, keepdims=True)
                    + params["b2"])
    return jnp.concatenate(outs, axis=1)                        # (B, T)


def make_params(key, input_dim, hidden_dim):
    """Deterministic synthetic parameters (shapes match the PyTorch module)."""
    ks = jax.random.split(key, 8)
    s = 0.1
    # LSTM: weight_ih (4H, D), weight_hh (4H, H), biases (4H,).  Stored
    # pre-transposed for right-multiplication inside the kernel.
    wih_t = (jax.random.normal(ks[0], (input_dim, 4 * hidden_dim)) * s).astype(jnp.float32)
    whh_t = (jax.random.normal(ks[1], (hidden_dim, 4 * hidden_dim)) * s).astype(jnp.float32)
    b_ih = (jax.random.normal(ks[2], (4 * hidden_dim,)) * s).astype(jnp.float32)
    b_hh = (jax.random.normal(ks[3], (4 * hidden_dim,)) * s).astype(jnp.float32)
    # fc1: (128, H) weight, (128,) bias;  fc2: (1, 128) weight, (1,) bias.
    w1_t = (jax.random.normal(ks[4], (hidden_dim, 128)) * s).astype(jnp.float32)
    b1 = (jax.random.normal(ks[5], (128,)) * s).astype(jnp.float32)
    w2_row = (jax.random.normal(ks[6], (1, 128)) * s).astype(jnp.float32)
    b2 = (jax.random.normal(ks[7], (1,)) * s).astype(jnp.float32)
    return {
        "wih_t": wih_t,
        "whh_t": whh_t,
        "b": (b_ih + b_hh).reshape(1, 4 * hidden_dim),
        "w1_t": w1_t,
        "b1": b1.reshape(1, 128),
        "w2_row": w2_row,          # fc2 weight as a (1, 128) row
        "b2": b2.reshape(1, 1),
    }


if __name__ == "__main__":
    # Small shapes implied by the forward: B=2 sequences, T=8 padded steps,
    # input_dim=16 features, hidden_dim=32.
    B, T, D, H = 2, 8, 16, 32
    key = jax.random.PRNGKey(0)
    k_x, k_p = jax.random.split(key)

    inputs = jax.random.normal(k_x, (B, T, D), dtype=jnp.float32)
    input_lengths = jnp.array([8, 5], dtype=jnp.int32)     # max == padded T
    params = make_params(k_p, D, H)

    logits = f0cnnae_forward(inputs, input_lengths, params)
    logits = jax.block_until_ready(logits)

    ref = f0cnnae_forward_ref(inputs, input_lengths, params)
    assert logits.shape == (B, T)
    assert jnp.allclose(logits, ref, atol=1e-5, rtol=1e-5), (
        "Pallas kernel does not match JAX reference")

    # TODO(synk): persistent self.hidden_state across forward() calls and the
    # MSELoss/get_loss training path are outside the kernel (host-side state).
    print("KERNEL_OK")
</pallas_src>

<mosaic_0001>
module attributes {stable_mosaic.version = 11 : i64} {
  func.func @_f0_lstm_fc_kernel(%arg0: memref<2x8x16xf32, #tpu.memory_space<vmem>>, %arg1: memref<2x1xi32, #tpu.memory_space<vmem>>, %arg2: memref<16x128xf32, #tpu.memory_space<vmem>>, %arg3: memref<32x128xf32, #tpu.memory_space<vmem>>, %arg4: memref<1x128xf32, #tpu.memory_space<vmem>>, %arg5: memref<32x128xf32, #tpu.memory_space<vmem>>, %arg6: memref<1x128xf32, #tpu.memory_space<vmem>>, %arg7: memref<1x128xf32, #tpu.memory_space<vmem>>, %arg8: memref<1x1xf32, #tpu.memory_space<vmem>>, %arg9: memref<16x1xf32, #tpu.memory_space<vmem>>, %arg10: memref<2x8x32xf32, #tpu.memory_space<vmem>>) attributes {dimension_semantics = [], scalar_prefetch = 0 : i64, scratch_operands = 1 : i64, tpu.core_type = #tpu.core_type<tc>} {
    %c0 = arith.constant 0 : index
    %c0_0 = arith.constant 0 : index
    %c0_1 = arith.constant 0 : index
    %0 = vector.load %arg0[%c0, %c0_0, %c0_1] : memref<2x8x16xf32, #tpu.memory_space<vmem>>, vector<2x8x16xf32>
    %1 = vector.shape_cast %0 : vector<2x8x16xf32> to vector<16x16xf32>
    %c0_2 = arith.constant 0 : index
    %c0_3 = arith.constant 0 : index
    %2 = vector.load %arg2[%c0_2, %c0_3] : memref<16x128xf32, #tpu.memory_space<vmem>>, vector<16x128xf32>
    %cst = arith.constant dense<0.000000e+00> : vector<16x128xf32>
    %3 = tpu.matmul %1, %2, %cst {dimension_numbers = #tpu.dot_dimension_numbers<[1], [0], [0], [1], [0, 0, 1, 1], [], []>} : vector<16x16xf32>, vector<16x128xf32>, vector<16x128xf32> -> vector<16x128xf32>
    %c0_4 = arith.constant 0 : index
    %c0_5 = arith.constant 0 : index
    %4 = vector.load %arg4[%c0_4, %c0_5] : memref<1x128xf32, #tpu.memory_space<vmem>>, vector<1x128xf32>
    %5 = vector.broadcast %4 : vector<1x128xf32> to vector<16x128xf32>
    %6 = arith.addf %3, %5 : vector<16x128xf32>
    %7 = vector.shape_cast %6 : vector<16x128xf32> to vector<2x8x128xf32>
    %c0_6 = arith.constant 0 : index
    %c0_7 = arith.constant 0 : index
    %8 = vector.load %arg1[%c0_6, %c0_7] : memref<2x1xi32, #tpu.memory_space<vmem>>, vector<2x1xi32>
    %cst_8 = arith.constant 0.000000e+00 : f32
    %9 = vector.broadcast %cst_8 : f32 to vector<2x32xf32>
    %cst_9 = arith.constant 0.000000e+00 : f32
    %10 = vector.broadcast %cst_9 : f32 to vector<2x32xf32>
    %11 = vector.extract_strided_slice %7 {offsets = [0, 0, 0], sizes = [2, 1, 128], strides = [1, 1, 1]} : vector<2x8x128xf32> to vector<2x1x128xf32>
    %12 = vector.shape_cast %11 : vector<2x1x128xf32> to vector<2x128xf32>
    %c0_10 = arith.constant 0 : index
    %c0_11 = arith.constant 0 : index
    %13 = vector.load %arg3[%c0_10, %c0_11] : memref<32x128xf32, #tpu.memory_space<vmem>>, vector<32x128xf32>
    %cst_12 = arith.constant dense<0.000000e+00> : vector<2x128xf32>
    %14 = tpu.matmul %9, %13, %cst_12 {dimension_numbers = #tpu.dot_dimension_numbers<[1], [0], [0], [1], [0, 0, 1, 1], [], []>} : vector<2x32xf32>, vector<32x128xf32>, vector<2x128xf32> -> vector<2x128xf32>
    %15 = arith.addf %12, %14 : vector<2x128xf32>
    %16 = vector.extract_strided_slice %15 {offsets = [0, 0], sizes = [2, 32], strides = [1, 1]} : vector<2x128xf32> to vector<2x32xf32>
    %17 = arith.negf %16 : vector<2x32xf32>
    %18 = math.exp %17 : vector<2x32xf32>
    %cst_13 = arith.constant 1.000000e+00 : f32
    %19 = vector.broadcast %cst_13 : f32 to vector<2x32xf32>
    %20 = arith.addf %19, %18 : vector<2x32xf32>
    %21 = arith.divf %19, %20 : vector<2x32xf32>
    %22 = vector.extract_strided_slice %15 {offsets = [0, 32], sizes = [2, 32], strides = [1, 1]} : vector<2x128xf32> to vector<2x32xf32>
    %23 = arith.negf %22 : vector<2x32xf32>
    %24 = math.exp %23 : vector<2x32xf32>
    %cst_14 = arith.constant 1.000000e+00 : f32
    %25 = vector.broadcast %cst_14 : f32 to vector<2x32xf32>
    %26 = arith.addf %25, %24 : vector<2x32xf32>
    %27 = arith.divf %25, %26 : vector<2x32xf32>
    %28 = vector.extract_strided_slice %15 {offsets = [0, 64], sizes = [2, 32], strides = [1, 1]} : vector<2x128xf32> to vector<2x32xf32>
    %29 = math.tanh %28 : vector<2x32xf32>
    %30 = vector.extract_strided_slice %15 {offsets = [0, 96], sizes = [2, 32], strides = [1, 1]} : vector<2x128xf32> to vector<2x32xf32>
    %31 = arith.negf %30 : vector<2x32xf32>
    %32 = math.exp %31 : vector<2x32xf32>
    %cst_15 = arith.constant 1.000000e+00 : f32
    %33 = vector.broadcast %cst_15 : f32 to vector<2x32xf32>
    %34 = arith.addf %33, %32 : vector<2x32xf32>
    %35 = arith.divf %33, %34 : vector<2x32xf32>
    %36 = arith.mulf %27, %10 : vector<2x32xf32>
    %37 = arith.mulf %21, %29 : vector<2x32xf32>
    %38 = arith.addf %36, %37 : vector<2x32xf32>
    %39 = math.tanh %38 : vector<2x32xf32>
    %40 = arith.mulf %35, %39 : vector<2x32xf32>
    %c0_i32 = arith.constant 0 : i32
    %41 = vector.broadcast %c0_i32 : i32 to vector<2x1xi32>
    %42 = arith.cmpi sgt, %8, %41 : vector<2x1xi32>
    %43 = vector.shape_cast %42 : vector<2x1xi1> to vector<2x1xi1>
    %44 = vector.broadcast %43 : vector<2x1xi1> to vector<2x32xi1>
    %45 = arith.select %44, %40, %9 : vector<2x32xi1>, vector<2x32xf32>
    %46 = vector.shape_cast %42 : vector<2x1xi1> to vector<2x1xi1>
    %47 = vector.broadcast %46 : vector<2x1xi1> to vector<2x32xi1>
    %48 = arith.select %47, %38, %10 : vector<2x32xi1>, vector<2x32xf32>
    %cst_16 = arith.constant 0.000000e+00 : f32
    %49 = vector.shape_cast %42 : vector<2x1xi1> to vector<2x1xi1>
    %50 = vector.broadcast %49 : vector<2x1xi1> to vector<2x32xi1>
    %51 = vector.broadcast %cst_16 : f32 to vector<2x32xf32>
    %52 = arith.select %50, %40, %51 : vector<2x32xi1>, vector<2x32xf32>
    %53 = vector.shape_cast %52 : vector<2x32xf32> to vector<2x1x32xf32>
    %c0_17 = arith.constant 0 : index
    %c0_18 = arith.constant 0 : index
    %c0_19 = arith.constant 0 : index
    %54 = vector.load %arg10[%c0_17, %c0_18, %c0_19] : memref<2x8x32xf32, #tpu.memory_space<vmem>>, vector<2x1x32xf32>
    tpu.vector_store %arg10[%c0_17, %c0_18, %c0_19], %53 {strides = array<i32>} : memref<2x8x32xf32, #tpu.memory_space<vmem>>, vector<2x1x32xf32>,
    %55 = vector.extract_strided_slice %7 {offsets = [0, 1, 0], sizes = [2, 1, 128], strides = [1, 1, 1]} : vector<2x8x128xf32> to vector<2x1x128xf32>
    %56 = vector.shape_cast %55 : vector<2x1x128xf32> to vector<2x128xf32>
    %c0_20 = arith.constant 0 : index
    %c0_21 = arith.constant 0 : index
    %57 = vector.load %arg3[%c0_20, %c0_21] : memref<32x128xf32, #tpu.memory_space<vmem>>, vector<32x128xf32>
    %cst_22 = arith.constant dense<0.000000e+00> : vector<2x128xf32>
    %58 = tpu.matmul %45, %57, %cst_22 {dimension_numbers = #tpu.dot_dimension_numbers<[1], [0], [0], [1], [0, 0, 1, 1], [], []>} : vector<2x32xf32>, vector<32x128xf32>, vector<2x128xf32> -> vector<2x128xf32>
    %59 = arith.addf %56, %58 : vector<2x128xf32>
    %60 = vector.extract_strided_slice %59 {offsets = [0, 0], sizes = [2, 32], strides = [1, 1]} : vector<2x128xf32> to vector<2x32xf32>
    %61 = arith.negf %60 : vector<2x32xf32>
    %62 = math.exp %61 : vector<2x32xf32>
    %cst_23 = arith.constant 1.000000e+00 : f32
    %63 = vector.broadcast %cst_23 : f32 to vector<2x32xf32>
    %64 = arith.addf %63, %62 : vector<2x32xf32>
    %65 = arith.divf %63, %64 : vector<2x32xf32>
    %66 = vector.extract_strided_slice %59 {offsets = [0, 32], sizes = [2, 32], strides = [1, 1]} : vector<2x128xf32> to vector<2x32xf32>
    %67 = arith.negf %66 : vector<2x32xf32>
    %68 = math.exp %67 : vector<2x32xf32>
    %cst_24 = arith.constant 1.000000e+00 : f32
    %69 = vector.broadcast %cst_24 : f32 to vector<2x32xf32>
    %70 = arith.addf %69, %68 : vector<2x32xf32>
    %71 = arith.divf %69, %70 : vector<2x32xf32>
    %72 = vector.extract_strided_slice %59 {offsets = [0, 64], sizes = [2, 32], strides = [1, 1]} : vector<2x128xf32> to vector<2x32xf32>
    %73 = math.tanh %72 : vector<2x32xf32>
    %74 = vector.extract_strided_slice %59 {offsets = [0, 96], sizes = [2, 32], strides = [1, 1]} : vector<2x128xf32> to vector<2x32xf32>
    %75 = arith.negf %74 : vector<2x32xf32>
    %76 = math.exp %75 : vector<2x32xf32>
    %cst_25 = arith.constant 1.000000e+00 : f32
    %77 = vector.broadcast %cst_25 : f32 to vector<2x32xf32>
    %78 = arith.addf %77, %76 : vector<2x32xf32>
    %79 = arith.divf %77, %78 : vector<2x32xf32>
    %80 = arith.mulf %71, %48 : vector<2x32xf32>
    %81 = arith.mulf %65, %73 : vector<2x32xf32>
    %82 = arith.addf %80, %81 : vector<2x32xf32>
    %83 = math.tanh %82 : vector<2x32xf32>
    %84 = arith.mulf %79, %83 : vector<2x32xf32>
    %c1_i32 = arith.constant 1 : i32
    %85 = vector.broadcast %c1_i32 : i32 to vector<2x1xi32>
    %86 = arith.cmpi sgt, %8, %85 : vector<2x1xi32>
    %87 = vector.shape_cast %86 : vector<2x1xi1> to vector<2x1xi1>
    %88 = vector.broadcast %87 : vector<2x1xi1> to vector<2x32xi1>
    %89 = arith.select %88, %84, %45 : vector<2x32xi1>, vector<2x32xf32>
    %90 = vector.shape_cast %86 : vector<2x1xi1> to vector<2x1xi1>
    %91 = vector.broadcast %90 : vector<2x1xi1> to vector<2x32xi1>
    %92 = arith.select %91, %82, %48 : vector<2x32xi1>, vector<2x32xf32>
    %cst_26 = arith.constant 0.000000e+00 : f32
    %93 = vector.shape_cast %86 : vector<2x1xi1> to vector<2x1xi1>
    %94 = vector.broadcast %93 : vector<2x1xi1> to vector<2x32xi1>
    %95 = vector.broadcast %cst_26 : f32 to vector<2x32xf32>
    %96 = arith.select %94, %84, %95 : vector<2x32xi1>, vector<2x32xf32>
    %97 = vector.shape_cast %96 : vector<2x32xf32> to vector<2x1x32xf32>
    %c0_27 = arith.constant 0 : index
    %c1 = arith.constant 1 : index
    %c0_28 = arith.constant 0 : index
    %98 = vector.load %arg10[%c0_27, %c1, %c0_28] : memref<2x8x32xf32, #tpu.memory_space<vmem>>, vector<2x1x32xf32>
    tpu.vector_store %arg10[%c0_27, %c1, %c0_28], %97 {strides = array<i32>} : memref<2x8x32xf32, #tpu.memory_space<vmem>>, vector<2x1x32xf32>,
    %99 = vector.extract_strided_slice %7 {offsets = [0, 2, 0], sizes = [2, 1, 128], strides = [1, 1, 1]} : vector<2x8x128xf32> to vector<2x1x128xf32>
    %100 = vector.shape_cast %99 : vector<2x1x128xf32> to vector<2x128xf32>
    %c0_29 = arith.constant 0 : index
    %c0_30 = arith.constant 0 : index
    %101 = vector.load %arg3[%c0_29, %c0_30] : memref<32x128xf32, #tpu.memory_space<vmem>>, vector<32x128xf32>
    %cst_31 = arith.constant dense<0.000000e+00> : vector<2x128xf32>
    %102 = tpu.matmul %89, %101, %cst_31 {dimension_numbers = #tpu.dot_dimension_numbers<[1], [0], [0], [1], [0, 0, 1, 1], [], []>} : vector<2x32xf32>, vector<32x128xf32>, vector<2x128xf32> -> vector<2x128xf32>
    %103 = arith.addf %100, %102 : vector<2x128xf32>
    %104 = vector.extract_strided_slice %103 {offsets = [0, 0], sizes = [2, 32], strides = [1, 1]} : vector<2x128xf32> to vector<2x32xf32>
    %105 = arith.negf %104 : vector<2x32xf32>
    %106 = math.exp %105 : vector<2x32xf32>
    %cst_32 = arith.constant 1.000000e+00 : f32
    %107 = vector.broadcast %cst_32 : f32 to vector<2x32xf32>
    %108 = arith.addf %107, %106 : vector<2x32xf32>
    %109 = arith.divf %107, %108 : vector<2x32xf32>
    %110 = vector.extract_strided_slice %103 {offsets = [0, 32], sizes = [2, 32], strides = [1, 1]} : vector<2x128xf32> to vector<2x32xf32>
    %111 = arith.negf %110 : vector<2x32xf32>
    %112 = math.exp %111 : vector<2x32xf32>
    %cst_33 = arith.constant 1.000000e+00 : f32
    %113 = vector.broadcast %cst_33 : f32 to vector<2x32xf32>
    %114 = arith.addf %113, %112 : vector<2x32xf32>
    %115 = arith.divf %113, %114 : vector<2x32xf32>
    %116 = vector.extract_strided_slice %103 {offsets = [0, 64], sizes = [2, 32], strides = [1, 1]} : vector<2x128xf32> to vector<2x32xf32>
    %117 = math.tanh %116 : vector<2x32xf32>
    %118 = vector.extract_strided_slice %103 {offsets = [0, 96], sizes = [2, 32], strides = [1, 1]} : vector<2x128xf32> to vector<2x32xf32>
    %119 = arith.negf %118 : vector<2x32xf32>
    %120 = math.exp %119 : vector<2x32xf32>
    %cst_34 = arith.constant 1.000000e+00 : f32
    %121 = vector.broadcast %cst_34 : f32 to vector<2x32xf32>
    %122 = arith.addf %121, %120 : vector<2x32xf32>
    %123 = arith.divf %121, %122 : vector<2x32xf32>
    %124 = arith.mulf %115, %92 : vector<2x32xf32>
    %125 = arith.mulf %109, %117 : vector<2x32xf32>
    %126 = arith.addf %124, %125 : vector<2x32xf32>
    %127 = math.tanh %126 : vector<2x32xf32>
    %128 = arith.mulf %123, %127 : vector<2x32xf32>
    %c2_i32 = arith.constant 2 : i32
    %129 = vector.broadcast %c2_i32 : i32 to vector<2x1xi32>
    %130 = arith.cmpi sgt, %8, %129 : vector<2x1xi32>
    %131 = vector.shape_cast %130 : vector<2x1xi1> to vector<2x1xi1>
    %132 = vector.broadcast %131 : vector<2x1xi1> to vector<2x32xi1>
    %133 = arith.select %132, %128, %89 : vector<2x32xi1>, vector<2x32xf32>
    %134 = vector.shape_cast %130 : vector<2x1xi1> to vector<2x1xi1>
    %135 = vector.broadcast %134 : vector<2x1xi1> to vector<2x32xi1>
    %136 = arith.select %135, %126, %92 : vector<2x32xi1>, vector<2x32xf32>
    %cst_35 = arith.constant 0.000000e+00 : f32
    %137 = vector.shape_cast %130 : vector<2x1xi1> to vector<2x1xi1>
    %138 = vector.broadcast %137 : vector<2x1xi1> to vector<2x32xi1>
    %139 = vector.broadcast %cst_35 : f32 to vector<2x32xf32>
    %140 = arith.select %138, %128, %139 : vector<2x32xi1>, vector<2x32xf32>
    %141 = vector.shape_cast %140 : vector<2x32xf32> to vector<2x1x32xf32>
    %c0_36 = arith.constant 0 : index
    %c2 = arith.constant 2 : index
    %c0_37 = arith.constant 0 : index
    %142 = vector.load %arg10[%c0_36, %c2, %c0_37] : memref<2x8x32xf32, #tpu.memory_space<vmem>>, vector<2x1x32xf32>
    tpu.vector_store %arg10[%c0_36, %c2, %c0_37], %141 {strides = array<i32>} : memref<2x8x32xf32, #tpu.memory_space<vmem>>, vector<2x1x32xf32>,
    %143 = vector.extract_strided_slice %7 {offsets = [0, 3, 0], sizes = [2, 1, 128], strides = [1, 1, 1]} : vector<2x8x128xf32> to vector<2x1x128xf32>
    %144 = vector.shape_cast %143 : vector<2x1x128xf32> to vector<2x128xf32>
    %c0_38 = arith.constant 0 : index
    %c0_39 = arith.constant 0 : index
    %145 = vector.load %arg3[%c0_38, %c0_39] : memref<32x128xf32, #tpu.memory_space<vmem>>, vector<32x128xf32>
    %cst_40 = arith.constant dense<0.000000e+00> : vector<2x128xf32>
    %146 = tpu.matmul %133, %145, %cst_40 {dimension_numbers = #tpu.dot_dimension_numbers<[1], [0], [0], [1], [0, 0, 1, 1], [], []>} : vector<2x32xf32>, vector<32x128xf32>, vector<2x128xf32> -> vector<2x128xf32>
    %147 = arith.addf %144, %146 : vector<2x128xf32>
    %148 = vector.extract_strided_slice %147 {offsets = [0, 0], sizes = [2, 32], strides = [1, 1]} : vector<2x128xf32> to vector<2x32xf32>
    %149 = arith.negf %148 : vector<2x32xf32>
    %150 = math.exp %149 : vector<2x32xf32>
    %cst_41 = arith.constant 1.000000e+00 : f32
    %151 = vector.broadcast %cst_41 : f32 to vector<2x32xf32>
    %152 = arith.addf %151, %150 : vector<2x32xf32>
    %153 = arith.divf %151, %152 : vector<2x32xf32>
    %154 = vector.extract_strided_slice %147 {offsets = [0, 32], sizes = [2, 32], strides = [1, 1]} : vector<2x128xf32> to vector<2x32xf32>
    %155 = arith.negf %154 : vector<2x32xf32>
    %156 = math.exp %155 : vector<2x32xf32>
    %cst_42 = arith.constant 1.000000e+00 : f32
    %157 = vector.broadcast %cst_42 : f32 to vector<2x32xf32>
    %158 = arith.addf %157, %156 : vector<2x32xf32>
    %159 = arith.divf %157, %158 : vector<2x32xf32>
    %160 = vector.extract_strided_slice %147 {offsets = [0, 64], sizes = [2, 32], strides = [1, 1]} : vector<2x128xf32> to vector<2x32xf32>
    %161 = math.tanh %160 : vector<2x32xf32>
    %162 = vector.extract_strided_slice %147 {offsets = [0, 96], sizes = [2, 32], strides = [1, 1]} : vector<2x128xf32> to vector<2x32xf32>
    %163 = arith.negf %162 : vector<2x32xf32>
    %164 = math.exp %163 : vector<2x32xf32>
    %cst_43 = arith.constant 1.000000e+00 : f32
    %165 = vector.broadcast %cst_43 : f32 to vector<2x32xf32>
    %166 = arith.addf %165, %164 : vector<2x32xf32>
    %167 = arith.divf %165, %166 : vector<2x32xf32>
    %168 = arith.mulf %159, %136 : vector<2x32xf32>
    %169 = arith.mulf %153, %161 : vector<2x32xf32>
    %170 = arith.addf %168, %169 : vector<2x32xf32>
    %171 = math.tanh %170 : vector<2x32xf32>
    %172 = arith.mulf %167, %171 : vector<2x32xf32>
    %c3_i32 = arith.constant 3 : i32
    %173 = vector.broadcast %c3_i32 : i32 to vector<2x1xi32>
    %174 = arith.cmpi sgt, %8, %173 : vector<2x1xi32>
    %175 = vector.shape_cast %174 : vector<2x1xi1> to vector<2x1xi1>
    %176 = vector.broadcast %175 : vector<2x1xi1> to vector<2x32xi1>
    %177 = arith.select %176, %172, %133 : vector<2x32xi1>, vector<2x32xf32>
    %178 = vector.shape_cast %174 : vector<2x1xi1> to vector<2x1xi1>
    %179 = vector.broadcast %178 : vector<2x1xi1> to vector<2x32xi1>
    %180 = arith.select %179, %170, %136 : vector<2x32xi1>, vector<2x32xf32>
    %cst_44 = arith.constant 0.000000e+00 : f32
    %181 = vector.shape_cast %174 : vector<2x1xi1> to vector<2x1xi1>
    %182 = vector.broadcast %181 : vector<2x1xi1> to vector<2x32xi1>
    %183 = vector.broadcast %cst_44 : f32 to vector<2x32xf32>
    %184 = arith.select %182, %172, %183 : vector<2x32xi1>, vector<2x32xf32>
    %185 = vector.shape_cast %184 : vector<2x32xf32> to vector<2x1x32xf32>
    %c0_45 = arith.constant 0 : index
    %c3 = arith.constant 3 : index
    %c0_46 = arith.constant 0 : index
    %186 = vector.load %arg10[%c0_45, %c3, %c0_46] : memref<2x8x32xf32, #tpu.memory_space<vmem>>, vector<2x1x32xf32>
    tpu.vector_store %arg10[%c0_45, %c3, %c0_46], %185 {strides = array<i32>} : memref<2x8x32xf32, #tpu.memory_space<vmem>>, vector<2x1x32xf32>,
    %187 = vector.extract_strided_slice %7 {offsets = [0, 4, 0], sizes = [2, 1, 128], strides = [1, 1, 1]} : vector<2x8x128xf32> to vector<2x1x128xf32>
    %188 = vector.shape_cast %187 : vector<2x1x128xf32> to vector<2x128xf32>
    %c0_47 = arith.constant 0 : index
    %c0_48 = arith.constant 0 : index
    %189 = vector.load %arg3[%c0_47, %c0_48] : memref<32x128xf32, #tpu.memory_space<vmem>>, vector<32x128xf32>
    %cst_49 = arith.constant dense<0.000000e+00> : vector<2x128xf32>
    %190 = tpu.matmul %177, %189, %cst_49 {dimension_numbers = #tpu.dot_dimension_numbers<[1], [0], [0], [1], [0, 0, 1, 1], [], []>} : vector<2x32xf32>, vector<32x128xf32>, vector<2x128xf32> -> vector<2x128xf32>
    %191 = arith.addf %188, %190 : vector<2x128xf32>
    %192 = vector.extract_strided_slice %191 {offsets = [0, 0], sizes = [2, 32], strides = [1, 1]} : vector<2x128xf32> to vector<2x32xf32>
    %193 = arith.negf %192 : vector<2x32xf32>
    %194 = math.exp %193 : vector<2x32xf32>
    %cst_50 = arith.constant 1.000000e+00 : f32
    %195 = vector.broadcast %cst_50 : f32 to vector<2x32xf32>
    %196 = arith.addf %195, %194 : vector<2x32xf32>
    %197 = arith.divf %195, %196 : vector<2x32xf32>
    %198 = vector.extract_strided_slice %191 {offsets = [0, 32], sizes = [2, 32], strides = [1, 1]} : vector<2x128xf32> to vector<2x32xf32>
    %199 = arith.negf %198 : vector<2x32xf32>
    %200 = math.exp %199 : vector<2x32xf32>
    %cst_51 = arith.constant 1.000000e+00 : f32
    %201 = vector.broadcast %cst_51 : f32 to vector<2x32xf32>
    %202 = arith.addf %201, %200 : vector<2x32xf32>
    %203 = arith.divf %201, %202 : vector<2x32xf32>
    %204 = vector.extract_strided_slice %191 {offsets = [0, 64], sizes = [2, 32], strides = [1, 1]} : vector<2x128xf32> to vector<2x32xf32>
    %205 = math.tanh %204 : vector<2x32xf32>
    %206 = vector.extract_strided_slice %191 {offsets = [0, 96], sizes = [2, 32], strides = [1, 1]} : vector<2x128xf32> to vector<2x32xf32>
    %207 = arith.negf %206 : vector<2x32xf32>
    %208 = math.exp %207 : vector<2x32xf32>
    %cst_52 = arith.constant 1.000000e+00 : f32
    %209 = vector.broadcast %cst_52 : f32 to vector<2x32xf32>
    %210 = arith.addf %209, %208 : vector<2x32xf32>
    %211 = arith.divf %209, %210 : vector<2x32xf32>
    %212 = arith.mulf %203, %180 : vector<2x32xf32>
    %213 = arith.mulf %197, %205 : vector<2x32xf32>
    %214 = arith.addf %212, %213 : vector<2x32xf32>
    %215 = math.tanh %214 : vector<2x32xf32>
    %216 = arith.mulf %211, %215 : vector<2x32xf32>
    %c4_i32 = arith.constant 4 : i32
    %217 = vector.broadcast %c4_i32 : i32 to vector<2x1xi32>
    %218 = arith.cmpi sgt, %8, %217 : vector<2x1xi32>
    %219 = vector.shape_cast %218 : vector<2x1xi1> to vector<2x1xi1>
    %220 = vector.broadcast %219 : vector<2x1xi1> to vector<2x32xi1>
    %221 = arith.select %220, %216, %177 : vector<2x32xi1>, vector<2x32xf32>
    %222 = vector.shape_cast %218 : vector<2x1xi1> to vector<2x1xi1>
    %223 = vector.broadcast %222 : vector<2x1xi1> to vector<2x32xi1>
    %224 = arith.select %223, %214, %180 : vector<2x32xi1>, vector<2x32xf32>
    %cst_53 = arith.constant 0.000000e+00 : f32
    %225 = vector.shape_cast %218 : vector<2x1xi1> to vector<2x1xi1>
    %226 = vector.broadcast %225 : vector<2x1xi1> to vector<2x32xi1>
    %227 = vector.broadcast %cst_53 : f32 to vector<2x32xf32>
    %228 = arith.select %226, %216, %227 : vector<2x32xi1>, vector<2x32xf32>
    %229 = vector.shape_cast %228 : vector<2x32xf32> to vector<2x1x32xf32>
    %c0_54 = arith.constant 0 : index
    %c4 = arith.constant 4 : index
    %c0_55 = arith.constant 0 : index
    %230 = vector.load %arg10[%c0_54, %c4, %c0_55] : memref<2x8x32xf32, #tpu.memory_space<vmem>>, vector<2x1x32xf32>
    tpu.vector_store %arg10[%c0_54, %c4, %c0_55], %229 {strides = array<i32>} : memref<2x8x32xf32, #tpu.memory_space<vmem>>, vector<2x1x32xf32>,
    %231 = vector.extract_strided_slice %7 {offsets = [0, 5, 0], sizes = [2, 1, 128], strides = [1, 1, 1]} : vector<2x8x128xf32> to vector<2x1x128xf32>
    %232 = vector.shape_cast %231 : vector<2x1x128xf32> to vector<2x128xf32>
    %c0_56 = arith.constant 0 : index
    %c0_57 = arith.constant 0 : index
    %233 = vector.load %arg3[%c0_56, %c0_57] : memref<32x128xf32, #tpu.memory_space<vmem>>, vector<32x128xf32>
    %cst_58 = arith.constant dense<0.000000e+00> : vector<2x128xf32>
    %234 = tpu.matmul %221, %233, %cst_58 {dimension_numbers = #tpu.dot_dimension_numbers<[1], [0], [0], [1], [0, 0, 1, 1], [], []>} : vector<2x32xf32>, vector<32x128xf32>, vector<2x128xf32> -> vector<2x128xf32>
    %235 = arith.addf %232, %234 : vector<2x128xf32>
    %236 = vector.extract_strided_slice %235 {offsets = [0, 0], sizes = [2, 32], strides = [1, 1]} : vector<2x128xf32> to vector<2x32xf32>
    %237 = arith.negf %236 : vector<2x32xf32>
    %238 = math.exp %237 : vector<2x32xf32>
    %cst_59 = arith.constant 1.000000e+00 : f32
    %239 = vector.broadcast %cst_59 : f32 to vector<2x32xf32>
    %240 = arith.addf %239, %238 : vector<2x32xf32>
    %241 = arith.divf %239, %240 : vector<2x32xf32>
    %242 = vector.extract_strided_slice %235 {offsets = [0, 32], sizes = [2, 32], strides = [1, 1]} : vector<2x128xf32> to vector<2x32xf32>
    %243 = arith.negf %242 : vector<2x32xf32>
    %244 = math.exp %243 : vector<2x32xf32>
    %cst_60 = arith.constant 1.000000e+00 : f32
    %245 = vector.broadcast %cst_60 : f32 to vector<2x32xf32>
    %246 = arith.addf %245, %244 : vector<2x32xf32>
    %247 = arith.divf %245, %246 : vector<2x32xf32>
    %248 = vector.extract_strided_slice %235 {offsets = [0, 64], sizes = [2, 32], strides = [1, 1]} : vector<2x128xf32> to vector<2x32xf32>
    %249 = math.tanh %248 : vector<2x32xf32>
    %250 = vector.extract_strided_slice %235 {offsets = [0, 96], sizes = [2, 32], strides = [1, 1]} : vector<2x128xf32> to vector<2x32xf32>
    %251 = arith.negf %250 : vector<2x32xf32>
    %252 = math.exp %251 : vector<2x32xf32>
    %cst_61 = arith.constant 1.000000e+00 : f32
    %253 = vector.broadcast %cst_61 : f32 to vector<2x32xf32>
    %254 = arith.addf %253, %252 : vector<2x32xf32>
    %255 = arith.divf %253, %254 : vector<2x32xf32>
    %256 = arith.mulf %247, %224 : vector<2x32xf32>
    %257 = arith.mulf %241, %249 : vector<2x32xf32>
    %258 = arith.addf %256, %257 : vector<2x32xf32>
    %259 = math.tanh %258 : vector<2x32xf32>
    %260 = arith.mulf %255, %259 : vector<2x32xf32>
    %c5_i32 = arith.constant 5 : i32
    %261 = vector.broadcast %c5_i32 : i32 to vector<2x1xi32>
    %262 = arith.cmpi sgt, %8, %261 : vector<2x1xi32>
    %263 = vector.shape_cast %262 : vector<2x1xi1> to vector<2x1xi1>
    %264 = vector.broadcast %263 : vector<2x1xi1> to vector<2x32xi1>
    %265 = arith.select %264, %260, %221 : vector<2x32xi1>, vector<2x32xf32>
    %266 = vector.shape_cast %262 : vector<2x1xi1> to vector<2x1xi1>
    %267 = vector.broadcast %266 : vector<2x1xi1> to vector<2x32xi1>
    %268 = arith.select %267, %258, %224 : vector<2x32xi1>, vector<2x32xf32>
    %cst_62 = arith.constant 0.000000e+00 : f32
    %269 = vector.shape_cast %262 : vector<2x1xi1> to vector<2x1xi1>
    %270 = vector.broadcast %269 : vector<2x1xi1> to vector<2x32xi1>
    %271 = vector.broadcast %cst_62 : f32 to vector<2x32xf32>
    %272 = arith.select %270, %260, %271 : vector<2x32xi1>, vector<2x32xf32>
    %273 = vector.shape_cast %272 : vector<2x32xf32> to vector<2x1x32xf32>
    %c0_63 = arith.constant 0 : index
    %c5 = arith.constant 5 : index
    %c0_64 = arith.constant 0 : index
    %274 = vector.load %arg10[%c0_63, %c5, %c0_64] : memref<2x8x32xf32, #tpu.memory_space<vmem>>, vector<2x1x32xf32>
    tpu.vector_store %arg10[%c0_63, %c5, %c0_64], %273 {strides = array<i32>} : memref<2x8x32xf32, #tpu.memory_space<vmem>>, vector<2x1x32xf32>,
    %275 = vector.extract_strided_slice %7 {offsets = [0, 6, 0], sizes = [2, 1, 128], strides = [1, 1, 1]} : vector<2x8x128xf32> to vector<2x1x128xf32>
    %276 = vector.shape_cast %275 : vector<2x1x128xf32> to vector<2x128xf32>
    %c0_65 = arith.constant 0 : index
    %c0_66 = arith.constant 0 : index
    %277 = vector.load %arg3[%c0_65, %c0_66] : memref<32x128xf32, #tpu.memory_space<vmem>>, vector<32x128xf32>
    %cst_67 = arith.constant dense<0.000000e+00> : vector<2x128xf32>
    %278 = tpu.matmul %265, %277, %cst_67 {dimension_numbers = #tpu.dot_dimension_numbers<[1], [0], [0], [1], [0, 0, 1, 1], [], []>} : vector<2x32xf32>, vector<32x128xf32>, vector<2x128xf32> -> vector<2x128xf32>
    %279 = arith.addf %276, %278 : vector<2x128xf32>
    %280 = vector.extract_strided_slice %279 {offsets = [0, 0], sizes = [2, 32], strides = [1, 1]} : vector<2x128xf32> to vector<2x32xf32>
    %281 = arith.negf %280 : vector<2x32xf32>
    %282 = math.exp %281 : vector<2x32xf32>
    %cst_68 = arith.constant 1.000000e+00 : f32
    %283 = vector.broadcast %cst_68 : f32 to vector<2x32xf32>
    %284 = arith.addf %283, %282 : vector<2x32xf32>
    %285 = arith.divf %283, %284 : vector<2x32xf32>
    %286 = vector.extract_strided_slice %279 {offsets = [0, 32], sizes = [2, 32], strides = [1, 1]} : vector<2x128xf32> to vector<2x32xf32>
    %287 = arith.negf %286 : vector<2x32xf32>
    %288 = math.exp %287 : vector<2x32xf32>
    %cst_69 = arith.constant 1.000000e+00 : f32
    %289 = vector.broadcast %cst_69 : f32 to vector<2x32xf32>
    %290 = arith.addf %289, %288 : vector<2x32xf32>
    %291 = arith.divf %289, %290 : vector<2x32xf32>
    %292 = vector.extract_strided_slice %279 {offsets = [0, 64], sizes = [2, 32], strides = [1, 1]} : vector<2x128xf32> to vector<2x32xf32>
    %293 = math.tanh %292 : vector<2x32xf32>
    %294 = vector.extract_strided_slice %279 {offsets = [0, 96], sizes = [2, 32], strides = [1, 1]} : vector<2x128xf32> to vector<2x32xf32>
    %295 = arith.negf %294 : vector<2x32xf32>
    %296 = math.exp %295 : vector<2x32xf32>
    %cst_70 = arith.constant 1.000000e+00 : f32
    %297 = vector.broadcast %cst_70 : f32 to vector<2x32xf32>
    %298 = arith.addf %297, %296 : vector<2x32xf32>
    %299 = arith.divf %297, %298 : vector<2x32xf32>
    %300 = arith.mulf %291, %268 : vector<2x32xf32>
    %301 = arith.mulf %285, %293 : vector<2x32xf32>
    %302 = arith.addf %300, %301 : vector<2x32xf32>
    %303 = math.tanh %302 : vector<2x32xf32>
    %304 = arith.mulf %299, %303 : vector<2x32xf32>
    %c6_i32 = arith.constant 6 : i32
    %305 = vector.broadcast %c6_i32 : i32 to vector<2x1xi32>
    %306 = arith.cmpi sgt, %8, %305 : vector<2x1xi32>
    %307 = vector.shape_cast %306 : vector<2x1xi1> to vector<2x1xi1>
    %308 = vector.broadcast %307 : vector<2x1xi1> to vector<2x32xi1>
    %309 = arith.select %308, %304, %265 : vector<2x32xi1>, vector<2x32xf32>
    %310 = vector.shape_cast %306 : vector<2x1xi1> to vector<2x1xi1>
    %311 = vector.broadcast %310 : vector<2x1xi1> to vector<2x32xi1>
    %312 = arith.select %311, %302, %268 : vector<2x32xi1>, vector<2x32xf32>
    %cst_71 = arith.constant 0.000000e+00 : f32
    %313 = vector.shape_cast %306 : vector<2x1xi1> to vector<2x1xi1>
    %314 = vector.broadcast %313 : vector<2x1xi1> to vector<2x32xi1>
    %315 = vector.broadcast %cst_71 : f32 to vector<2x32xf32>
    %316 = arith.select %314, %304, %315 : vector<2x32xi1>, vector<2x32xf32>
    %317 = vector.shape_cast %316 : vector<2x32xf32> to vector<2x1x32xf32>
    %c0_72 = arith.constant 0 : index
    %c6 = arith.constant 6 : index
    %c0_73 = arith.constant 0 : index
    %318 = vector.load %arg10[%c0_72, %c6, %c0_73] : memref<2x8x32xf32, #tpu.memory_space<vmem>>, vector<2x1x32xf32>
    tpu.vector_store %arg10[%c0_72, %c6, %c0_73], %317 {strides = array<i32>} : memref<2x8x32xf32, #tpu.memory_space<vmem>>, vector<2x1x32xf32>,
    %319 = vector.extract_strided_slice %7 {offsets = [0, 7, 0], sizes = [2, 1, 128], strides = [1, 1, 1]} : vector<2x8x128xf32> to vector<2x1x128xf32>
    %320 = vector.shape_cast %319 : vector<2x1x128xf32> to vector<2x128xf32>
    %c0_74 = arith.constant 0 : index
    %c0_75 = arith.constant 0 : index
    %321 = vector.load %arg3[%c0_74, %c0_75] : memref<32x128xf32, #tpu.memory_space<vmem>>, vector<32x128xf32>
    %cst_76 = arith.constant dense<0.000000e+00> : vector<2x128xf32>
    %322 = tpu.matmul %309, %321, %cst_76 {dimension_numbers = #tpu.dot_dimension_numbers<[1], [0], [0], [1], [0, 0, 1, 1], [], []>} : vector<2x32xf32>, vector<32x128xf32>, vector<2x128xf32> -> vector<2x128xf32>
    %323 = arith.addf %320, %322 : vector<2x128xf32>
    %324 = vector.extract_strided_slice %323 {offsets = [0, 0], sizes = [2, 32], strides = [1, 1]} : vector<2x128xf32> to vector<2x32xf32>
    %325 = arith.negf %324 : vector<2x32xf32>
    %326 = math.exp %325 : vector<2x32xf32>
    %cst_77 = arith.constant 1.000000e+00 : f32
    %327 = vector.broadcast %cst_77 : f32 to vector<2x32xf32>
    %328 = arith.addf %327, %326 : vector<2x32xf32>
    %329 = arith.divf %327, %328 : vector<2x32xf32>
    %330 = vector.extract_strided_slice %323 {offsets = [0, 32], sizes = [2, 32], strides = [1, 1]} : vector<2x128xf32> to vector<2x32xf32>
    %331 = arith.negf %330 : vector<2x32xf32>
    %332 = math.exp %331 : vector<2x32xf32>
    %cst_78 = arith.constant 1.000000e+00 : f32
    %333 = vector.broadcast %cst_78 : f32 to vector<2x32xf32>
    %334 = arith.addf %333, %332 : vector<2x32xf32>
    %335 = arith.divf %333, %334 : vector<2x32xf32>
    %336 = vector.extract_strided_slice %323 {offsets = [0, 64], sizes = [2, 32], strides = [1, 1]} : vector<2x128xf32> to vector<2x32xf32>
    %337 = math.tanh %336 : vector<2x32xf32>
    %338 = vector.extract_strided_slice %323 {offsets = [0, 96], sizes = [2, 32], strides = [1, 1]} : vector<2x128xf32> to vector<2x32xf32>
    %339 = arith.negf %338 : vector<2x32xf32>
    %340 = math.exp %339 : vector<2x32xf32>
    %cst_79 = arith.constant 1.000000e+00 : f32
    %341 = vector.broadcast %cst_79 : f32 to vector<2x32xf32>
    %342 = arith.addf %341, %340 : vector<2x32xf32>
    %343 = arith.divf %341, %342 : vector<2x32xf32>
    %344 = arith.mulf %335, %312 : vector<2x32xf32>
    %345 = arith.mulf %329, %337 : vector<2x32xf32>
    %346 = arith.addf %344, %345 : vector<2x32xf32>
    %347 = math.tanh %346 : vector<2x32xf32>
    %348 = arith.mulf %343, %347 : vector<2x32xf32>
    %c7_i32 = arith.constant 7 : i32
    %349 = vector.broadcast %c7_i32 : i32 to vector<2x1xi32>
    %350 = arith.cmpi sgt, %8, %349 : vector<2x1xi32>
    %cst_80 = arith.constant 0.000000e+00 : f32
    %351 = vector.shape_cast %350 : vector<2x1xi1> to vector<2x1xi1>
    %352 = vector.broadcast %351 : vector<2x1xi1> to vector<2x32xi1>
    %353 = vector.broadcast %cst_80 : f32 to vector<2x32xf32>
    %354 = arith.select %352, %348, %353 : vector<2x32xi1>, vector<2x32xf32>
    %355 = vector.shape_cast %354 : vector<2x32xf32> to vector<2x1x32xf32>
    %c0_81 = arith.constant 0 : index
    %c7 = arith.constant 7 : index
    %c0_82 = arith.constant 0 : index
    %356 = vector.load %arg10[%c0_81, %c7, %c0_82] : memref<2x8x32xf32, #tpu.memory_space<vmem>>, vector<2x1x32xf32>
    tpu.vector_store %arg10[%c0_81, %c7, %c0_82], %355 {strides = array<i32>} : memref<2x8x32xf32, #tpu.memory_space<vmem>>, vector<2x1x32xf32>,
    %c0_83 = arith.constant 0 : index
    %c0_84 = arith.constant 0 : index
    %c0_85 = arith.constant 0 : index
    %357 = vector.load %arg10[%c0_83, %c0_84, %c0_85] : memref<2x8x32xf32, #tpu.memory_space<vmem>>, vector<2x8x32xf32>
    %358 = vector.shape_cast %357 : vector<2x8x32xf32> to vector<16x32xf32>
    %c0_86 = arith.constant 0 : index
    %c0_87 = arith.constant 0 : index
    %359 = vector.load %arg5[%c0_86, %c0_87] : memref<32x128xf32, #tpu.memory_space<vmem>>, vector<32x128xf32>
    %cst_88 = arith.constant dense<0.000000e+00> : vector<16x128xf32>
    %360 = tpu.matmul %358, %359, %cst_88 {dimension_numbers = #tpu.dot_dimension_numbers<[1], [0], [0], [1], [0, 0, 1, 1], [], []>} : vector<16x32xf32>, vector<32x128xf32>, vector<16x128xf32> -> vector<16x128xf32>
    %c0_89 = arith.constant 0 : index
    %c0_90 = arith.constant 0 : index
    %361 = vector.load %arg6[%c0_89, %c0_90] : memref<1x128xf32, #tpu.memory_space<vmem>>, vector<1x128xf32>
    %362 = vector.broadcast %361 : vector<1x128xf32> to vector<16x128xf32>
    %363 = arith.addf %360, %362 : vector<16x128xf32>
    %cst_91 = arith.constant 0.000000e+00 : f32
    %364 = vector.broadcast %cst_91 : f32 to vector<16x128xf32>
    %365 = arith.maximumf %363, %364 : vector<16x128xf32>
    %c0_92 = arith.constant 0 : index
    %c0_93 = arith.constant 0 : index
    %366 = vector.load %arg7[%c0_92, %c0_93] : memref<1x128xf32, #tpu.memory_space<vmem>>, vector<1x128xf32>
    %367 = vector.broadcast %366 : vector<1x128xf32> to vector<16x128xf32>
    %368 = arith.mulf %365, %367 : vector<16x128xf32>
    %cst_94 = arith.constant dense<0.000000e+00> : vector<16xf32>
    %369 = vector.multi_reduction <add>, %368, %cst_94 [1] : vector<16x128xf32> to vector<16xf32>
    %370 = vector.shape_cast %369 : vector<16xf32> to vector<16x1xf32>
    %c0_95 = arith.constant 0 : index
    %c0_96 = arith.constant 0 : index
    %371 = vector.load %arg8[%c0_95, %c0_96] : memref<1x1xf32, #tpu.memory_space<vmem>>, vector<1x1xf32>
    %372 = vector.broadcast %371 : vector<1x1xf32> to vector<16x1xf32>
    %373 = arith.addf %370, %372 : vector<16x1xf32>
    %c0_97 = arith.constant 0 : index
    %c0_98 = arith.constant 0 : index
    %374 = vector.load %arg9[%c0_97, %c0_98] : memref<16x1xf32, #tpu.memory_space<vmem>>, vector<16x1xf32>
    tpu.vector_store %arg9[%c0_97, %c0_98], %373 {strides = array<i32>} : memref<16x1xf32, #tpu.memory_space<vmem>>, vector<16x1xf32>,
    return
  }
}

</mosaic_0001>

<bundles_post_ra>
// kernel: tpu_custom_call.1
= control target key start
LH: loop header
LB: loop body
LE: loop exit
PB: predicated region body
PF: predicated region fallthrough
CT: control target
= control target key end

     0   :  { %s2788_s0 = inlined_call_operand.hbm [shape: f32[2,8,16], index: 0, kind: input, shape index: {}]   ;;  %s2789_s1 = inlined_call_operand.vmem [shape: s32[2,1], index: 1, kind: input, shape index: {}]   ;;  %s2790_s2 = inlined_call_operand.hbm [shape: f32[16,128], index: 2, kind: input, shape index: {}]   ;;  %s2791_s3 = inlined_call_operand.hbm [shape: f32[32,128], index: 3, kind: input, shape index: {}]   ;;  %s2792_s4 = inlined_call_operand.vmem [shape: f32[1,128], index: 4, kind: input, shape index: {}]   ;;  %s2793_s5 = inlined_call_operand.hbm [shape: f32[32,128], index: 5, kind: input, shape index: {}]   ;;  %s2794_s6 = inlined_call_operand.vmem [shape: f32[1,128], index: 6, kind: input, shape index: {}]   ;;  %s2795_s7 = inlined_call_operand.vmem [shape: f32[1,128], index: 7, kind: input, shape index: {}]   ;;  %s2796_s8 = inlined_call_operand.<no memory space> [shape: f32[1,1], index: 8, kind: input, shape index: {}]   ;;  %s2797_s9 = inlined_call_operand.vmem [shape: f32[16,1], index: 9, kind: output, shape index: {}]  }
   0x1   :  { %v14_v0 = vstv %s2796_s8 }
   0x2   :  { %15 = vst [vmem:[#allocation3] sm:$0x1] %v14_v0 }
   0x3   :  { %16 = vsyncpa [#allocation5], 0 }
   0x4   :  { %17 = vsyncpa [#allocation7], 0 }
   0x5   :  { %18 = vsyncpa [#allocation10], 0  ;;  %s2316_s11 = smov [#allocation6]   ;;  %s2317_s13 = smov [#allocation4]  }
   0x6   :  { %s38_s12 = sshll.u32 %s2316_s11, 4  ;;  %s24_s14 = sshll.u32 %s2317_s13, 4  ;;  %s39_s12 = int_to_ptr.vmem [resolvable:$true] %s38_s12  ;;  %s2383_s14 = int_to_ptr.vmem [resolvable:$true] %s24_s14 }
   0x7   :  { %s2222_s17 = scalar_lea.hbm %s2790_s2, 256 }
   0x8   :  { %p2223_p0 = scmp.ne.s32.totalorder %s2790_s2, %s2222_s17  ;;  %p2226_p1 = scmp.lt.u32.totalorder %s2222_s17, %s2790_s2 }
   0xa   :  { %p2228_p2 = pnand %p2226_p1, %p2223_p0 }
   0xc   :  { %2231 = shalt.err (!%p2228_p2)
}
   0xd   :  { %s2232_s21 = scalar_lea.vmem %s39_s12, 256  ;;  %p2237_p4 = scmp.lt.s32.totalorder %s39_s12, %s39_s12 }
   0xe   :  { %p2233_p3 = scmp.ne.s32.totalorder %s39_s12, %s2232_s21  ;;  %p2238_p5 = scmp.lt.s32.totalorder %s2232_s21, %s2232_s21 }
  0x10   :  { %p2239_p6 = por %p2238_p5, %p2237_p4 }
  0x12   :  { %p2240_p7 = pnand %p2239_p6, %p2233_p3 }
  0x14   :  { %2243 = shalt.err (!%p2240_p7)
}
  0x15   :  { %s2318_s22 = smov 128   ;;  %s2319_s23 = smov 8  }
  0x16   :  { %44 = dma.hbm_to_vmem [thread:$0]  %s2790_s2, 256, %s39_s12, [#allocation7], %s2318_s22, %s2318_s22, %s2319_s23  }
  0x17   :  { %s2244_s28 = scalar_lea.hbm %s2788_s0, 256 }
  0x18   :  { %p2245_p8 = scmp.ne.s32.totalorder %s2788_s0, %s2244_s28  ;;  %p2248_p9 = scmp.lt.u32.totalorder %s2244_s28, %s2788_s0 }
  0x1a   :  { %p2250_p10 = pnand %p2248_p9, %p2245_p8 }
  0x1c   :  { %2253 = shalt.err (!%p2250_p10)
}
  0x1d   :  { %s2254_s13 = scalar_lea.vmem %s2383_s14, 256  ;;  %p2259_p12 = scmp.lt.s32.totalorder %s2383_s14, %s2383_s14 }
  0x1e   :  { %p2255_p11 = scmp.ne.s32.totalorder %s2383_s14, %s2254_s13  ;;  %p2260_p13 = scmp.lt.s32.totalorder %s2254_s13, %s2254_s13 }
  0x20   :  { %p2261_p0 = por %p2260_p13, %p2259_p12 }
  0x22   :  { %p2262_p1 = pnand %p2261_p0, %p2255_p11 }
  0x24   :  { %2265 = shalt.err (!%p2262_p1)
}
  0x25   :  { %30 = dma.hbm_to_vmem [thread:$0]  %s2788_s0, 256, %s2383_s14, [#allocation5], %s2318_s22, %s2318_s22, %s2319_s23  }
  0x26   :  { %s2320_s15 = smov [#allocation8]   ;;  %s2321_s17 = smov [#allocation9]  }
  0x27   :  { %s50_s16 = sshll.u32 %s2320_s15, 4  ;;  %s64_s18 = sshll.u32 %s2321_s17, 4  ;;  %s51_s16 = int_to_ptr.vmem [resolvable:$true] %s50_s16  ;;  %s2420_s18 = int_to_ptr.vmem [resolvable:$true] %s64_s18 }
  0x28   :  { %s2266_s20 = scalar_lea.hbm %s2791_s3, 512 }
  0x29   :  { %p2267_p2 = scmp.ne.s32.totalorder %s2791_s3, %s2266_s20  ;;  %p2270_p3 = scmp.lt.u32.totalorder %s2266_s20, %s2791_s3 }
  0x2b   :  { %p2272_p4 = pnand %p2270_p3, %p2267_p2 }
  0x2d   :  { %2275 = shalt.err (!%p2272_p4)
}
  0x2e   :  { %s2276_s0 = scalar_lea.vmem %s51_s16, 512  ;;  %p2281_p6 = scmp.lt.s32.totalorder %s51_s16, %s51_s16 }
  0x2f   :  { %p2277_p5 = scmp.ne.s32.totalorder %s51_s16, %s2276_s0  ;;  %p2282_p7 = scmp.lt.s32.totalorder %s2276_s0, %s2276_s0 }
  0x31   :  { %p2283_p8 = por %p2282_p7, %p2281_p6 }
  0x33   :  { %p2284_p9 = pnand %p2283_p8, %p2277_p5 }
  0x35   :  { %2287 = shalt.err (!%p2284_p9)
}
  0x36   :  { %56 = dma.hbm_to_vmem [thread:$0]  %s2791_s3, 512, %s51_s16, [#allocation7], %s2318_s22, %s2318_s22, %s2319_s23  }
  0x37   :  { %s2288_s30 = scalar_lea.hbm %s2793_s5, 512 }
  0x38   :  { %p2289_p10 = scmp.ne.s32.totalorder %s2793_s5, %s2288_s30  ;;  %p2292_p11 = scmp.lt.u32.totalorder %s2288_s30, %s2793_s5 }
  0x3a   :  { %p2294_p12 = pnand %p2292_p11, %p2289_p10 }
  0x3c   :  { %2297 = shalt.err (!%p2294_p12)
}
  0x3d   :  { %s2298_s12 = scalar_lea.vmem %s2420_s18, 512  ;;  %p2303_p0 = scmp.lt.s32.totalorder %s2420_s18, %s2420_s18 }
  0x3e   :  { %p2299_p13 = scmp.ne.s32.totalorder %s2420_s18, %s2298_s12  ;;  %p2304_p1 = scmp.lt.s32.totalorder %s2298_s12, %s2298_s12 }
  0x40   :  { %p2305_p2 = por %p2304_p1, %p2303_p0 }
  0x42   :  { %p2306_p3 = pnand %p2305_p2, %p2299_p13 }
  0x44   :  { %2309 = shalt.err (!%p2306_p3)
}
  0x45   :  { %70 = dma.hbm_to_vmem [thread:$0]  %s2793_s5, 512, %s2420_s18, [#allocation10], %s2318_s22, %s2318_s22, %s2319_s23  }
  0x46   :  { %2310 = dma.done.wait [#allocation5], 256  }
  0x47   :  { %2311 = vsyncadd [#allocation5], 4294967040 }
  0x48   :  { %2312 = dma.done.wait [#allocation7], 768  }
  0x49   :  { %2313 = vsyncadd [#allocation7], 4294966528 }
  0x4a   :  { %2314 = dma.done.wait [#allocation10], 512  }
  0x4b   :  { %2315 = vsyncadd [#allocation10], 4294966784  ;;  %v2322_v1 = vmov 0.0|0.0   ;;  %vm2323_vm0 = vmmov 0   ;;  %v2324_v2 = vmov 0.0   ;;  %vm100_vm1 = vcmask 130048  }
  0x4c   :  { %2021 = vmatprep.subr.bf16.mxu1 %v2322_v1  ;;  %1926 = vmatprep.mubr.msk.f32.mxu1 %vm2323_vm0, %v2324_v2  ;;  %v91_v3 = vld [vmem:[#allocation6] sm:$0xff]  ;;  %v92_v4 = vld [vmem:[#allocation6 + $0x8] sm:$0xff]  ;;  %v183_v5 = vld [vmem:[#allocation8] sm:$0xff]  ;;  %s2325_s23 = smov 64   ;;  %v2327_v38 = vmov 0   ;;  %vm324_vm2 = vcmask 1041409   ;;  %v342_v59 = vlaneseq }
  0x4d   :  { %v2017_v6 = vpack.c.bf16 %v92_v4, %v91_v3  ;;  %v184_v7 = vld [vmem:[#allocation8 + $0x8] sm:$0xff]  ;;  %v89_v8 = vld [vmem:[#allocation4] sm:$0xff]  ;;  %v185_v10 = vld [vmem:[#allocation8 + $0x10] sm:$0xff]  ;;  %2091 = vset.pattern.permute.xlu0 %v2327_v38  ;;  %2092 = vset.pattern.permute.xlu1 %v2327_v38  ;;  %s2328_s18 = smov 96   ;;  %v2329_v57 = vmov 1966171168  }
  0x4e   :  { %v2460_v9 = vpack.c.bf16 %v184_v7, %v183_v5  ;;  %1915 = vmatprep.mubr.msk.f32.mxu0 %vm100_vm1, %v89_v8  ;;  %v186_v11 = vld [vmem:[#allocation8 + $0x18] sm:$0xff]  ;;  %v90_v12 = vld [vmem:[#allocation4 + $0x8] sm:$0xff]  ;;  %v340_v58 = vunpack.c.l.s4 %v2329_v57  ;;  %v343_v61 = vshrl.u32 %v342_v59, 7  ;;  %vm187_vm5 = vcmask 261120  }
  0x4f   :  { %2018 = vmatprep.subr.bf16.mxu0 %v2017_v6  ;;  %v2464_v13 = vpack.c.bf16 %v186_v11, %v185_v10  ;;  %v1830_v16 = vld [vmem:[%s2792_s4] ss:$0 sm:$0xff]  ;;  %s2326_s4 = smov 32   ;;  %vm363_vm6 = vcmask 253952  }
  0x50   :  { %2023 = vmatpush3.bf16.msra.mxu1 %v2460_v9  ;;  %2020 = vmatpush3.bf16.msra.mxu0 %v2017_v6  ;;  %v2503_v47 = vld [vmem:[%s2789_s1] sm:$0x3]  ;;  %v341_v60 = vunpack.c.0.s8 %v340_v58 }
  0x51   :  { %2024 = vmatprep.subr.bf16.mxu1 %v2322_v1  ;;  %2027 = vmatprep.subr.bf16.mxu0 %v2322_v1  ;;  %vm315_vm3 = vcmp.gt.s32.totalorder %v2503_v47, 0  ;;  %vm504_vm7 = vcmp.gt.s32.totalorder %v2503_v47, 1  ;;  %vm695_vm9 = vcmp.gt.s32.totalorder %v2503_v47, 2  ;;  %vm888_vm11 = vcmp.gt.s32.totalorder %v2503_v47, 3 }
  0x52   :  { %v316_v49 = vsel %vm315_vm3, 1, %v2327_v38  ;;  %v2512_v63 = vsub.s32 %v341_v60, %v343_v61  ;;  %vm1081_vm13 = vcmp.gt.s32.totalorder %v2503_v47, 4  ;;  %vm1274_vm15 = vcmp.gt.s32.totalorder %v2503_v47, 5 }
  0x53   :  { %1916 = vmatmul.mubr.msk.f32.vlgmr.msra.gmra.mrb[0].mxu0 %vm100_vm1, %v90_v12  ;;  %vm1467_vm1 = vcmp.gt.s32.totalorder %v2503_v47, 6  ;;  %v1522_v47 = vld [vmem:[#allocation8 + $0x18] sm:$0xff] }
  0x54   :  { %2026 = vmatpush3.bf16.msra.mxu1 %v2464_v13  ;;  %2029 = vmatpush3.bf16.msra.mxu0 %v2460_v9 }
  0x55   :  { %2030 = vmatprep.subr.bf16.mxu0 %v2322_v1  ;;  %1937 = vmatprep.mubr.msk.f32.mxu0 %vm2323_vm0, %v2324_v2 }
  0x56   :  { %2033 = vmatprep.subr.bf16.mxu1 %v2322_v1 }
  0x57   :  { %1927 = vmatmul.mubr.f32.vlgmr.msra.gmra.mrb[0].mxu1 %v2324_v2 }
  0x58   :  { %2032 = vmatpush3.bf16.msra.mxu0 %v2464_v13  ;;  %2035 = vmatpush3.bf16.msra.mxu1 %v2460_v9 }
  0x59   :  { %2036 = vmatprep.subr.bf16.mxu1 %v2322_v1  ;;  %1948 = vmatprep.mubr.msk.f32.mxu1 %vm2323_vm0, %v2324_v2 }
  0x5a   :  { %2039 = vmatprep.subr.bf16.mxu0 %v2322_v1 }
  0x5c   :  { %2038 = vmatpush3.bf16.msra.mxu1 %v2464_v13 }
  0x5d   :  { %2045 = vmatprep.subr.bf16.mxu1 %v2322_v1 }
 0x126   :  { %v1917_v14 = vpop.f32.mrb[0].mxu0 }
 0x127   :  { %v173_v15 = vpop.f32.mrb[1].mxu0  ;;  %v2487_v17 = vadd.f32 %v1917_v14, %v1830_v16 }
 0x128   :  { %v2489_v21 = vadd.f32 %v1830_v16, %v173_v15 }
 0x12a   :  { %v257_v18 = vpop.f32.mrb[0].mxu1 }
 0x12b   :  { %v262_v19 = vrot.slane %v257_v18, 1  ;;  %v1928_v20 = vpop.f32.mrb[1].mxu1  ;;  %v265_v23 = vadd.f32 %v257_v18, %v2489_v21 }
 0x12d   :  { %v266_v22 = vadd.f32 %v262_v19, %v2487_v17  ;;  %v1833_v27 = vmul.f32 -1.442695, %v265_v23 }
 0x12f   :  { %2093 = vtanh.f32 %v266_v22  ;;  %v1834_v26 = vmul.f32 -1.442695, %v266_v22 }
 0x130   :  { %2095 = vtanh.f32 %v265_v23 }
 0x131   :  { %2097 = vpow2.f32 %v1834_v26 }
 0x132   :  { %2099 = vpow2.f32 %v1833_v27 }
 0x139   :  { %v2094_v24 = vpop.eup %2093 }
 0x13a   :  { %287 = vrot.lane.b32.xlu0 %v2094_v24, %s2325_s23  ;;  %v2096_v25 = vpop.eup %2095 }
 0x13b   :  { %v2098_v28 = vpop.eup %2097 }
 0x13c   :  { %v274_v29 = vadd.f32 1.0, %v2098_v28  ;;  %v2100_v30 = vpop.eup %2099 }
 0x13d   :  { %v273_v31 = vadd.f32 1.0, %v2100_v30 }
 0x13e   :  { %285 = vrot.lane.b32.xlu0 %v2096_v25, %s2325_s23  ;;  %2101 = vrcp.f32 %v274_v29 }
 0x13f   :  { %2103 = vrcp.f32 %v273_v31 }
 0x148   :  { %v2102_v32 = vpop.eup %2101 }
 0x149   :  { %v2104_v35 = vpop.eup %2103  ;;  %v282_v39 = vmul.f32 0.0, %v2102_v32 }
 0x14a   :  { %v281_v42 = vmul.f32 0.0, %v2104_v35 }
 0x1ac   :  { %v288_v33 = vpop.permute.xlu0 %287 }
 0x1ad   :  { %v292_v34 = vmul.f32 %v2102_v32, %v288_v33 }
 0x1af   :  { %297 = vrot.lane.b32.xlu1 %v292_v34, %s2326_s4 }
 0x1b0   :  { %v286_v36 = vpop.permute.xlu0 %285 }
 0x1b1   :  { %v291_v37 = vmul.f32 %v2104_v35, %v286_v36 }
 0x1b3   :  { %295 = vrot.lane.b32.xlu1 %v291_v37, %s2326_s4 }
 0x221   :  { %v298_v40 = vpop.permute.xlu1 %297 }
 0x222   :  { %v302_v41 = vadd.f32 %v298_v40, %v282_v39 }
 0x224   :  { %2105 = vtanh.f32 %v302_v41  ;;  %v332_v44 = vrot.slane %v302_v41, 7 }
 0x225   :  { %v296_v43 = vpop.permute.xlu1 %295 }
 0x226   :  { %v301_v45 = vadd.f32 %v296_v43, %v281_v42 }
 0x228   :  { %2107 = vtanh.f32 %v301_v45  ;;  %v333_v46 = vsel %vm324_vm2, %v332_v44, %v301_v45  ;;  %v505_v45 = vsel %vm504_vm7, 1, %v2327_v38 }
 0x22e   :  { %v2106_v48 = vpop.eup %2105 }
 0x22f   :  { %309 = vrot.lane.b32.xlu0 %v2106_v48, %s2325_s23 }
 0x232   :  { %v2108_v50 = vpop.eup %2107 }
 0x233   :  { %307 = vrot.lane.b32.xlu1 %v2108_v50, %s2325_s23  ;;  %318 = vperm.xlu0 %2091, %v316_v49  }
 0x2a1   :  { %v310_v51 = vpop.permute.xlu0 %309 }
 0x2a2   :  { %v314_v52 = vmul.f32 %v2102_v32, %v310_v51 }
 0x2a4   :  { %v323_v54 = vrot.slane %v314_v52, 7 }
 0x2a5   :  { %v308_v53 = vpop.permute.xlu1 %307 }
 0x2a6   :  { %v313_v55 = vmul.f32 %v2104_v35, %v308_v53 }
 0x2a8   :  { %v325_v56 = vsel %vm324_vm2, %v323_v54, %v313_v55 }
 0x2a9   :  { %326 = vrot.lane.b32.xlu1 %v325_v56, %s2326_s4 }
 0x2ad   :  { %334 = vrot.lane.b32.xlu1 %v333_v46, %s2328_s18 }
 0x2b2   :  { %v319_v62 = vpop.permute.xlu0 %318 }
 0x2b3   :  { %vm320_vm4 = vcmp.eq.s32.totalorder %v319_v62, 1 }
 0x31b   :  { %v327_v0 = vpop.permute.xlu1 %326 }
 0x31c   :  { %v2515_v3 = vsel %vm320_vm4, %v327_v0, 0.0 }
 0x31d   :  { %v345_v4 = vrot.slane %v2515_v3, %v2512_v63  ;;  %1938 = vmatmul.mubr.msk.f32.vlgmr.msra.gmra.mrb[2].mxu0 %vm187_vm5, %v2515_v3 }
 0x31e   :  { %2041 = vmatpush3.bf16.msra.mxu0 %v2460_v9  ;;  %1959 = vmatprep.mubr.msk.f32.mxu0 %vm2323_vm0, %v2324_v2 }
 0x31f   :  { %v346_v5 = vcombine.high %v345_v4, %v345_v4  ;;  %v353_v6 = vrot.slane %v345_v4, %v2512_v63  ;;  %2042 = vmatprep.subr.bf16.mxu0 %v2322_v1  ;;  %v335_v16 = vpop.permute.xlu1 %334 }
 0x320   :  { %v2535_v19 = vsel %vm320_vm4, %v335_v16, 0.0 }
 0x321   :  { %v360_v7 = vrot.slane %v346_v5, %v2512_v63  ;;  %364 = vst.msk [vmem:[#allocation2] sm:$0x1] %vm363_vm6, %v353_v6  ;;  %v463_v20 = vrot.slane %v2535_v19, 7 }
 0x322   :  { %2044 = vmatpush3.bf16.msra.mxu0 %v2464_v13 }
 0x323   :  { %365 = vst.msk [vmem:[#allocation2 + $0x8] sm:$0x1] %vm363_vm6, %v360_v7  ;;  %2051 = vmatprep.subr.bf16.mxu0 %v2322_v1 }
 0x3f0   :  { %v438_v8 = vpop.f32.mrb[2].mxu0 }
 0x3f1   :  { %v443_v10 = vrot.slane %v438_v8, 7  ;;  %v447_v11 = vadd.f32 %v438_v8, %v2487_v17  ;;  %v1939_v12 = vpop.f32.mrb[3].mxu0 }
 0x3f3   :  { %v446_v14 = vadd.f32 %v443_v10, %v2489_v21  ;;  %2109 = vtanh.f32 %v447_v11  ;;  %v1837_v22 = vmul.f32 -1.442695, %v447_v11 }
 0x3f5   :  { %2111 = vtanh.f32 %v446_v14  ;;  %v1836_v23 = vmul.f32 -1.442695, %v446_v14 }
 0x3f6   :  { %2113 = vpow2.f32 %v1837_v22 }
 0x3f7   :  { %2115 = vpow2.f32 %v1836_v23 }
 0x3fd   :  { %v2110_v15 = vpop.eup %2109 }
 0x3fe   :  { %476 = vrot.lane.b32.xlu1 %v2110_v15, %s2325_s23 }
 0x3ff   :  { %v2112_v18 = vpop.eup %2111 }
 0x400   :  { %474 = vrot.lane.b32.xlu0 %v2112_v18, %s2325_s23  ;;  %v2114_v24 = vpop.eup %2113 }
 0x401   :  { %v2116_v25 = vpop.eup %2115  ;;  %v455_v26 = vadd.f32 1.0, %v2114_v24 }
 0x402   :  { %466 = vrot.lane.b32.xlu1 %v2535_v19, %s2326_s4  ;;  %v454_v27 = vadd.f32 1.0, %v2116_v25 }
 0x403   :  { %2117 = vrcp.f32 %v455_v26 }
 0x404   :  { %464 = vrot.lane.b32.xlu0 %v463_v20, %s2326_s4  ;;  %2119 = vrcp.f32 %v454_v27 }
 0x40d   :  { %v2118_v28 = vpop.eup %2117 }
 0x40e   :  { %v2120_v31 = vpop.eup %2119 }
 0x470   :  { %v477_v29 = vpop.permute.xlu1 %476 }
 0x471   :  { %v481_v30 = vmul.f32 %v2118_v28, %v477_v29 }
 0x472   :  { %v475_v32 = vpop.permute.xlu0 %474 }
 0x473   :  { %486 = vrot.lane.b32.xlu1 %v481_v30, %s2326_s4  ;;  %v480_v33 = vmul.f32 %v2120_v31, %v475_v32 }
 0x474   :  { %v467_v34 = vpop.permute.xlu1 %466 }
 0x475   :  { %484 = vrot.lane.b32.xlu0 %v480_v33, %s2326_s4  ;;  %v471_v35 = vmul.f32 %v2118_v28, %v467_v34 }
 0x476   :  { %v465_v36 = vpop.permute.xlu0 %464 }
 0x477   :  { %v470_v40 = vmul.f32 %v2120_v31, %v465_v36 }
 0x4e5   :  { %v487_v37 = vpop.permute.xlu1 %486 }
 0x4e6   :  { %v491_v39 = vadd.f32 %v487_v37, %v471_v35 }
 0x4e7   :  { %v485_v41 = vpop.permute.xlu0 %484 }
 0x4e8   :  { %2121 = vtanh.f32 %v491_v39  ;;  %v490_v42 = vadd.f32 %v485_v41, %v470_v40  ;;  %v696_v41 = vsel %vm695_vm9, 1, %v2327_v38 }
 0x4ea   :  { %2123 = vtanh.f32 %v490_v42  ;;  %v520_v46 = vrot.slane %v490_v42, 1 }
 0x4ec   :  { %v521_v48 = vsel %vm324_vm2, %v491_v39, %v520_v46 }
 0x4f2   :  { %v2122_v43 = vpop.eup %2121 }
 0x4f3   :  { %498 = vrot.lane.b32.xlu1 %v2122_v43, %s2325_s23 }
 0x4f4   :  { %v2124_v44 = vpop.eup %2123 }
 0x4f5   :  { %496 = vrot.lane.b32.xlu0 %v2124_v44, %s2325_s23 }
 0x4f9   :  { %507 = vperm.xlu0 %2091, %v505_v45  }
 0x4fd   :  { %522 = vrot.lane.b32.xlu0 %v521_v48, %s2328_s18 }
 0x565   :  { %v499_v49 = vpop.permute.xlu1 %498 }
 0x566   :  { %v503_v52 = vmul.f32 %v2118_v28, %v499_v49 }
 0x567   :  { %v497_v50 = vpop.permute.xlu0 %496 }
 0x568   :  { %v502_v51 = vmul.f32 %v2120_v31, %v497_v50 }
 0x56a   :  { %v512_v53 = vrot.slane %v502_v51, 1 }
 0x56c   :  { %v513_v54 = vsel %vm324_vm2, %v503_v52, %v512_v53 }
 0x56d   :  { %514 = vrot.lane.b32.xlu1 %v513_v54, %s2326_s4 }
 0x578   :  { %v508_v55 = vpop.permute.xlu0 %507 }
 0x579   :  { %vm509_vm8 = vcmp.eq.s32.totalorder %v508_v55, 1 }
 0x57c   :  { %v523_v8 = vpop.permute.xlu0 %522 }
 0x57d   :  { %v2574_v11 = vsel %vm509_vm8, %v523_v8, %v2535_v19 }
 0x57e   :  { %v653_v14 = vrot.slane %v2574_v11, 6  ;;  %v654_v15 = vrot.slane %v2574_v11, 7 }
 0x5df   :  { %v515_v56 = vpop.permute.xlu1 %514 }
 0x5e0   :  { %v2554_v57 = vsel %vm509_vm8, %v515_v56, %v2515_v3  ;;  %v526_v58 = vsel %vm509_vm8, %v515_v56, 0.0 }
 0x5e1   :  { %v534_v59 = vrot.slane %v526_v58, %v2512_v63  ;;  %1949 = vmatmul.mubr.msk.f32.vlgmr.msra.gmra.mrb[2].mxu1 %vm187_vm5, %v2554_v57 }
 0x5e2   :  { %2047 = vmatpush3.bf16.msra.mxu1 %v2460_v9  ;;  %1970 = vmatprep.mubr.msk.f32.mxu1 %vm2323_vm0, %v2324_v2 }
 0x5e3   :  { %v535_v60 = vcombine.high %v534_v59, %v534_v59  ;;  %v542_v61 = vrot.slane %v534_v59, %v2512_v63  ;;  %2048 = vmatprep.subr.bf16.mxu1 %v2322_v1 }
 0x5e5   :  { %v549_v62 = vrot.slane %v535_v60, %v2512_v63  ;;  %552 = vst.msk [vmem:[#allocation2 + $0x1] sm:$0x1] %vm363_vm6, %v542_v61 }
 0x5e6   :  { %2050 = vmatpush3.bf16.msra.mxu1 %v2464_v13 }
 0x5e7   :  { %553 = vst.msk [vmem:[#allocation2 + $0x9] sm:$0x1] %vm363_vm6, %v549_v62  ;;  %2057 = vmatprep.subr.bf16.mxu1 %v2322_v1 }
 0x6b4   :  { %v627_v0 = vpop.f32.mrb[2].mxu1 }
 0x6b5   :  { %v632_v3 = vrot.slane %v627_v0, 6  ;;  %v633_v4 = vrot.slane %v627_v0, 7  ;;  %v1950_v5 = vpop.f32.mrb[3].mxu1 }
 0x6b7   :  { %v636_v6 = vadd.f32 %v632_v3, %v2489_v21  ;;  %v637_v7 = vadd.f32 %v633_v4, %v2487_v17 }
 0x6b9   :  { %2125 = vtanh.f32 %v636_v6  ;;  %v1839_v16 = vmul.f32 -1.442695, %v636_v6  ;;  %v1840_v18 = vmul.f32 -1.442695, %v637_v7 }
 0x6ba   :  { %2127 = vtanh.f32 %v637_v7 }
 0x6bb   :  { %2129 = vpow2.f32 %v1839_v16 }
 0x6bc   :  { %2131 = vpow2.f32 %v1840_v18 }
 0x6c3   :  { %v2126_v10 = vpop.eup %2125 }
 0x6c4   :  { %v2128_v12 = vpop.eup %2127  ;;  %665 = vrot.lane.b32.xlu1 %v2126_v10, %s2325_s23 }
 0x6c5   :  { %667 = vrot.lane.b32.xlu0 %v2128_v12, %s2325_s23  ;;  %v2130_v20 = vpop.eup %2129 }
 0x6c6   :  { %v2132_v19 = vpop.eup %2131  ;;  %v644_v22 = vadd.f32 1.0, %v2130_v20 }
 0x6c7   :  { %v645_v23 = vadd.f32 1.0, %v2132_v19 }
 0x6c8   :  { %655 = vrot.lane.b32.xlu1 %v653_v14, %s2326_s4  ;;  %2133 = vrcp.f32 %v644_v22 }
 0x6c9   :  { %657 = vrot.lane.b32.xlu0 %v654_v15, %s2326_s4  ;;  %2135 = vrcp.f32 %v645_v23 }
 0x6d2   :  { %v2134_v24 = vpop.eup %2133 }
 0x6d3   :  { %v2136_v26 = vpop.eup %2135 }
 0x736   :  { %v666_v25 = vpop.permute.xlu1 %665 }
 0x737   :  { %v668_v27 = vpop.permute.xlu0 %667  ;;  %v671_v28 = vmul.f32 %v2134_v24, %v666_v25 }
 0x738   :  { %v672_v29 = vmul.f32 %v2136_v26, %v668_v27 }
 0x739   :  { %675 = vrot.lane.b32.xlu1 %v671_v28, %s2326_s4 }
 0x73a   :  { %677 = vrot.lane.b32.xlu0 %v672_v29, %s2326_s4  ;;  %v656_v30 = vpop.permute.xlu1 %655 }
 0x73b   :  { %v658_v31 = vpop.permute.xlu0 %657  ;;  %v661_v32 = vmul.f32 %v2134_v24, %v656_v30 }
 0x73c   :  { %v662_v33 = vmul.f32 %v2136_v26, %v658_v31 }
 0x7ab   :  { %v676_v34 = vpop.permute.xlu1 %675 }
 0x7ac   :  { %v678_v35 = vpop.permute.xlu0 %677  ;;  %v681_v36 = vadd.f32 %v676_v34, %v661_v32 }
 0x7ad   :  { %v682_v37 = vadd.f32 %v678_v35, %v662_v33 }
 0x7ae   :  { %2137 = vtanh.f32 %v681_v36  ;;  %v712_v43 = vrot.slane %v681_v36, 2 }
 0x7af   :  { %2139 = vtanh.f32 %v682_v37  ;;  %v713_v42 = vrot.slane %v682_v37, 1 }
 0x7b1   :  { %v714_v44 = vsel %vm324_vm2, %v713_v42, %v712_v43 }
 0x7b8   :  { %v2138_v39 = vpop.eup %2137 }
 0x7b9   :  { %v2140_v40 = vpop.eup %2139  ;;  %687 = vrot.lane.b32.xlu1 %v2138_v39, %s2325_s23  ;;  %v889_v39 = vsel %vm888_vm11, 1, %v2327_v38 }
 0x7ba   :  { %689 = vrot.lane.b32.xlu0 %v2140_v40, %s2325_s23 }
 0x7bd   :  { %698 = vperm.xlu1 %2092, %v696_v41  }
 0x7c1   :  { %715 = vrot.lane.b32.xlu1 %v714_v44, %s2328_s18 }
 0x82b   :  { %v688_v45 = vpop.permute.xlu1 %687 }
 0x82c   :  { %v690_v46 = vpop.permute.xlu0 %689  ;;  %v693_v48 = vmul.f32 %v2134_v24, %v688_v45 }
 0x82d   :  { %v694_v49 = vmul.f32 %v2136_v26, %v690_v46 }
 0x82e   :  { %v703_v50 = vrot.slane %v693_v48, 2 }
 0x82f   :  { %v704_v51 = vrot.slane %v694_v49, 1 }
 0x831   :  { %v705_v52 = vsel %vm324_vm2, %v704_v51, %v703_v50 }
 0x832   :  { %706 = vrot.lane.b32.xlu0 %v705_v52, %s2326_s4 }
 0x83c   :  { %v699_v53 = vpop.permute.xlu1 %698 }
 0x83d   :  { %vm700_vm10 = vcmp.eq.s32.totalorder %v699_v53, 1 }
 0x840   :  { %v716_v6 = vpop.permute.xlu1 %715 }
 0x841   :  { %v2614_v8 = vsel %vm700_vm10, %v716_v6, %v2574_v11 }
 0x842   :  { %v846_v12 = vrot.slane %v2614_v8, 5  ;;  %v847_v14 = vrot.slane %v2614_v8, 6 }
 0x8a4   :  { %v707_v54 = vpop.permute.xlu0 %706 }
 0x8a5   :  { %v2594_v55 = vsel %vm700_vm10, %v707_v54, %v2554_v57  ;;  %v719_v56 = vsel %vm700_vm10, %v707_v54, 0.0 }
 0x8a6   :  { %v727_v58 = vrot.slane %v719_v56, %v2512_v63  ;;  %1960 = vmatmul.mubr.msk.f32.vlgmr.msra.gmra.mrb[4].mxu0 %vm187_vm5, %v2594_v55 }
 0x8a7   :  { %2053 = vmatpush3.bf16.msra.mxu0 %v2460_v9  ;;  %1981 = vmatprep.mubr.msk.f32.mxu0 %vm2323_vm0, %v2324_v2 }
 0x8a8   :  { %v728_v59 = vcombine.high %v727_v58, %v727_v58  ;;  %v735_v60 = vrot.slane %v727_v58, %v2512_v63  ;;  %2054 = vmatprep.subr.bf16.mxu0 %v2322_v1 }
 0x8aa   :  { %v742_v57 = vrot.slane %v728_v59, %v2512_v63  ;;  %745 = vst.msk [vmem:[#allocation2 + $0x2] sm:$0x1] %vm363_vm6, %v735_v60 }
 0x8ab   :  { %2056 = vmatpush3.bf16.msra.mxu0 %v2464_v13 }
 0x8ac   :  { %746 = vst.msk [vmem:[#allocation2 + $0xa] sm:$0x1] %vm363_vm6, %v742_v57  ;;  %2063 = vmatprep.subr.bf16.mxu0 %v2322_v1 }
 0x979   :  { %v820_v61 = vpop.f32.mrb[4].mxu0 }
 0x97a   :  { %v825_v62 = vrot.slane %v820_v61, 5  ;;  %v826_v0 = vrot.slane %v820_v61, 6  ;;  %v1961_v3 = vpop.f32.mrb[5].mxu0 }
 0x97c   :  { %v829_v4 = vadd.f32 %v825_v62, %v2489_v21  ;;  %v830_v5 = vadd.f32 %v826_v0, %v2487_v17 }
 0x97e   :  { %2141 = vtanh.f32 %v829_v4  ;;  %v1842_v15 = vmul.f32 -1.442695, %v829_v4  ;;  %v1843_v16 = vmul.f32 -1.442695, %v830_v5 }
 0x97f   :  { %2143 = vtanh.f32 %v830_v5 }
 0x980   :  { %2145 = vpow2.f32 %v1842_v15 }
 0x981   :  { %2147 = vpow2.f32 %v1843_v16 }
 0x988   :  { %v2142_v7 = vpop.eup %2141 }
 0x989   :  { %v2144_v10 = vpop.eup %2143  ;;  %858 = vrot.lane.b32.xlu0 %v2142_v7, %s2325_s23 }
 0x98a   :  { %860 = vrot.lane.b32.xlu1 %v2144_v10, %s2325_s23  ;;  %v2146_v18 = vpop.eup %2145 }
 0x98b   :  { %v2148_v11 = vpop.eup %2147  ;;  %v837_v20 = vadd.f32 1.0, %v2146_v18 }
 0x98c   :  { %v838_v19 = vadd.f32 1.0, %v2148_v11 }
 0x98d   :  { %848 = vrot.lane.b32.xlu0 %v846_v12, %s2326_s4  ;;  %2149 = vrcp.f32 %v837_v20 }
 0x98e   :  { %850 = vrot.lane.b32.xlu1 %v847_v14, %s2326_s4  ;;  %2151 = vrcp.f32 %v838_v19 }
 0x997   :  { %v2150_v22 = vpop.eup %2149 }
 0x998   :  { %v2152_v24 = vpop.eup %2151 }
 0x9fb   :  { %v859_v23 = vpop.permute.xlu0 %858 }
 0x9fc   :  { %v864_v25 = vmul.f32 %v2150_v22, %v859_v23  ;;  %v861_v26 = vpop.permute.xlu1 %860 }
 0x9fd   :  { %v865_v27 = vmul.f32 %v2152_v24, %v861_v26 }
 0x9fe   :  { %868 = vrot.lane.b32.xlu0 %v864_v25, %s2326_s4 }
 0x9ff   :  { %870 = vrot.lane.b32.xlu1 %v865_v27, %s2326_s4  ;;  %v849_v28 = vpop.permute.xlu0 %848 }
 0xa00   :  { %v851_v29 = vpop.permute.xlu1 %850  ;;  %v854_v30 = vmul.f32 %v2150_v22, %v849_v28 }
 0xa01   :  { %v855_v31 = vmul.f32 %v2152_v24, %v851_v29 }
 0xa70   :  { %v869_v32 = vpop.permute.xlu0 %868 }
 0xa71   :  { %v874_v33 = vadd.f32 %v869_v32, %v854_v30  ;;  %v871_v34 = vpop.permute.xlu1 %870 }
 0xa72   :  { %v875_v35 = vadd.f32 %v871_v34, %v855_v31  ;;  %v1082_v34 = vsel %vm1081_vm13, 1, %v2327_v38 }
 0xa73   :  { %2153 = vtanh.f32 %v874_v33  ;;  %v905_v40 = vrot.slane %v874_v33, 3 }
 0xa74   :  { %2155 = vtanh.f32 %v875_v35  ;;  %v906_v41 = vrot.slane %v875_v35, 2 }
 0xa76   :  { %v907_v42 = vsel %vm324_vm2, %v906_v41, %v905_v40 }
 0xa7d   :  { %v2154_v36 = vpop.eup %2153 }
 0xa7e   :  { %v2156_v37 = vpop.eup %2155  ;;  %880 = vrot.lane.b32.xlu0 %v2154_v36, %s2325_s23 }
 0xa7f   :  { %882 = vrot.lane.b32.xlu1 %v2156_v37, %s2325_s23 }
 0xa82   :  { %891 = vperm.xlu0 %2091, %v889_v39  }
 0xa86   :  { %908 = vrot.lane.b32.xlu0 %v907_v42, %s2328_s18 }
 0xaf0   :  { %v881_v43 = vpop.permute.xlu0 %880 }
 0xaf1   :  { %v886_v44 = vmul.f32 %v2150_v22, %v881_v43  ;;  %v883_v45 = vpop.permute.xlu1 %882 }
 0xaf2   :  { %v887_v46 = vmul.f32 %v2152_v24, %v883_v45 }
 0xaf3   :  { %v896_v48 = vrot.slane %v886_v44, 3 }
 0xaf4   :  { %v897_v49 = vrot.slane %v887_v46, 2 }
 0xaf6   :  { %v898_v50 = vsel %vm324_vm2, %v897_v49, %v896_v48 }
 0xaf7   :  { %899 = vrot.lane.b32.xlu1 %v898_v50, %s2326_s4 }
 0xb01   :  { %v892_v51 = vpop.permute.xlu0 %891 }
 0xb02   :  { %vm893_vm12 = vcmp.eq.s32.totalorder %v892_v51, 1 }
 0xb05   :  { %v909_v3 = vpop.permute.xlu0 %908 }
 0xb06   :  { %v2653_v5 = vsel %vm893_vm12, %v909_v3, %v2614_v8 }
 0xb07   :  { %v1040_v7 = vrot.slane %v2653_v5, 5 }
 0xb69   :  { %v900_v52 = vpop.permute.xlu1 %899 }
 0xb6a   :  { %v2634_v53 = vsel %vm893_vm12, %v900_v52, %v2594_v55  ;;  %v912_v54 = vsel %vm893_vm12, %v900_v52, 0.0 }
 0xb6b   :  { %v920_v56 = vrot.slane %v912_v54, %v2512_v63  ;;  %1971 = vmatmul.mubr.msk.f32.vlgmr.msra.gmra.mrb[4].mxu1 %vm187_vm5, %v2634_v53 }
 0xb6c   :  { %2059 = vmatpush3.bf16.msra.mxu1 %v2460_v9  ;;  %1992 = vmatprep.mubr.msk.f32.mxu1 %vm2323_vm0, %v2324_v2 }
 0xb6d   :  { %v921_v58 = vcombine.high %v920_v56, %v920_v56  ;;  %v928_v59 = vrot.slane %v920_v56, %v2512_v63  ;;  %2060 = vmatprep.subr.bf16.mxu1 %v2322_v1 }
 0xb6f   :  { %v935_v55 = vrot.slane %v921_v58, %v2512_v63  ;;  %938 = vst.msk [vmem:[#allocation2 + $0x3] sm:$0x1] %vm363_vm6, %v928_v59 }
 0xb70   :  { %2062 = vmatpush3.bf16.msra.mxu1 %v2464_v13  ;;  %v1039_v13 = vrot.slane %v2653_v5, 4 }
 0xb71   :  { %939 = vst.msk [vmem:[#allocation2 + $0xb] sm:$0x1] %vm363_vm6, %v935_v55 }
 0xc3e   :  { %v1013_v60 = vpop.f32.mrb[4].mxu1 }
 0xc3f   :  { %v1018_v57 = vrot.slane %v1013_v60, 4  ;;  %v1019_v61 = vrot.slane %v1013_v60, 5  ;;  %v1972_v9 = vpop.f32.mrb[5].mxu1 }
 0xc41   :  { %v1022_v62 = vadd.f32 %v1018_v57, %v2489_v21  ;;  %v1023_v0 = vadd.f32 %v1019_v61, %v2487_v17 }
 0xc43   :  { %2157 = vtanh.f32 %v1022_v62  ;;  %v1845_v10 = vmul.f32 -1.442695, %v1022_v62  ;;  %v1846_v12 = vmul.f32 -1.442695, %v1023_v0 }
 0xc44   :  { %2159 = vtanh.f32 %v1023_v0 }
 0xc45   :  { %2161 = vpow2.f32 %v1845_v10 }
 0xc46   :  { %2163 = vpow2.f32 %v1846_v12 }
 0xc4d   :  { %v2158_v4 = vpop.eup %2157 }
 0xc4e   :  { %v2160_v6 = vpop.eup %2159  ;;  %1051 = vrot.lane.b32.xlu1 %v2158_v4, %s2325_s23 }
 0xc4f   :  { %1053 = vrot.lane.b32.xlu0 %v2160_v6, %s2325_s23  ;;  %v2162_v14 = vpop.eup %2161 }
 0xc50   :  { %v2164_v8 = vpop.eup %2163  ;;  %v1030_v15 = vadd.f32 1.0, %v2162_v14 }
 0xc51   :  { %v1031_v16 = vadd.f32 1.0, %v2164_v8 }
 0xc52   :  { %1041 = vrot.lane.b32.xlu1 %v1039_v13, %s2326_s4  ;;  %2165 = vrcp.f32 %v1030_v15 }
 0xc53   :  { %1043 = vrot.lane.b32.xlu0 %v1040_v7, %s2326_s4  ;;  %2167 = vrcp.f32 %v1031_v16 }
 0xc5c   :  { %v2166_v18 = vpop.eup %2165 }
 0xc5d   :  { %v2168_v20 = vpop.eup %2167 }
 0xcc0   :  { %v1052_v11 = vpop.permute.xlu1 %1051 }
 0xcc1   :  { %v1054_v19 = vpop.permute.xlu0 %1053  ;;  %v1057_v22 = vmul.f32 %v2166_v18, %v1052_v11 }
 0xcc2   :  { %v1058_v23 = vmul.f32 %v2168_v20, %v1054_v19 }
 0xcc3   :  { %1061 = vrot.lane.b32.xlu1 %v1057_v22, %s2326_s4 }
 0xcc4   :  { %1063 = vrot.lane.b32.xlu0 %v1058_v23, %s2326_s4  ;;  %v1042_v24 = vpop.permute.xlu1 %1041 }
 0xcc5   :  { %v1044_v25 = vpop.permute.xlu0 %1043  ;;  %v1047_v26 = vmul.f32 %v2166_v18, %v1042_v24 }
 0xcc6   :  { %v1048_v27 = vmul.f32 %v2168_v20, %v1044_v25 }
 0xd35   :  { %v1062_v28 = vpop.permute.xlu1 %1061 }
 0xd36   :  { %v1064_v29 = vpop.permute.xlu0 %1063  ;;  %v1067_v30 = vadd.f32 %v1062_v28, %v1047_v26 }
 0xd37   :  { %v1068_v31 = vadd.f32 %v1064_v29, %v1048_v27  ;;  %v1275_v29 = vsel %vm1274_vm15, 1, %v2327_v38 }
 0xd38   :  { %2169 = vtanh.f32 %v1067_v30  ;;  %v1098_v36 = vrot.slane %v1067_v30, 4 }
 0xd39   :  { %2171 = vtanh.f32 %v1068_v31  ;;  %v1099_v35 = vrot.slane %v1068_v31, 3 }
 0xd3b   :  { %v1100_v37 = vsel %vm324_vm2, %v1099_v35, %v1098_v36 }
 0xd42   :  { %v2170_v32 = vpop.eup %2169 }
 0xd43   :  { %v2172_v33 = vpop.eup %2171  ;;  %1073 = vrot.lane.b32.xlu1 %v2170_v32, %s2325_s23 }
 0xd44   :  { %1075 = vrot.lane.b32.xlu0 %v2172_v33, %s2325_s23 }
 0xd47   :  { %1084 = vperm.xlu1 %2092, %v1082_v34  }
 0xd4b   :  { %1101 = vrot.lane.b32.xlu1 %v1100_v37, %s2328_s18 }
 0xdb5   :  { %v1074_v39 = vpop.permute.xlu1 %1073 }
 0xdb6   :  { %v1076_v40 = vpop.permute.xlu0 %1075  ;;  %v1079_v41 = vmul.f32 %v2166_v18, %v1074_v39 }
 0xdb7   :  { %v1080_v42 = vmul.f32 %v2168_v20, %v1076_v40 }
 0xdb8   :  { %v1089_v43 = vrot.slane %v1079_v41, 4 }
 0xdb9   :  { %v1090_v44 = vrot.slane %v1080_v42, 3 }
 0xdbb   :  { %v1091_v45 = vsel %vm324_vm2, %v1090_v44, %v1089_v43 }
 0xdbc   :  { %1092 = vrot.lane.b32.xlu0 %v1091_v45, %s2326_s4 }
 0xdc6   :  { %v1085_v46 = vpop.permute.xlu1 %1084 }
 0xdc7   :  { %vm1086_vm14 = vcmp.eq.s32.totalorder %v1085_v46, 1 }
 0xe2e   :  { %v1093_v48 = vpop.permute.xlu0 %1092 }
 0xe2f   :  { %v2673_v49 = vsel %vm1086_vm14, %v1093_v48, %v2634_v53  ;;  %v1105_v50 = vsel %vm1086_vm14, %v1093_v48, 0.0 }
 0xe30   :  { %v1113_v51 = vrot.slane %v1105_v50, %v2512_v63  ;;  %1982 = vmatmul.mubr.msk.f32.vlgmr.msra.gmra.mrb[6].mxu0 %vm187_vm5, %v2673_v49 }
 0xe31   :  { %2003 = vmatprep.mubr.msk.f32.mxu0 %vm2323_vm0, %v2324_v2  ;;  %v1102_v2 = vpop.permute.xlu1 %1101 }
 0xe32   :  { %v1114_v52 = vcombine.high %v1113_v51, %v1113_v51  ;;  %v1121_v54 = vrot.slane %v1113_v51, %v2512_v63  ;;  %v2689_v9 = vsel %vm1086_vm14, %v1102_v2, %v2653_v5 }
 0xe33   :  { %v1232_v0 = vrot.slane %v2689_v9, 3  ;;  %v1233_v3 = vrot.slane %v2689_v9, 4 }
 0xe34   :  { %v1128_v56 = vrot.slane %v1114_v52, %v2512_v63  ;;  %1131 = vst.msk [vmem:[#allocation2 + $0x4] sm:$0x1] %vm363_vm6, %v1121_v54 }
 0xe36   :  { %1132 = vst.msk [vmem:[#allocation2 + $0xc] sm:$0x1] %vm363_vm6, %v1128_v56 }
 0xf03   :  { %v1206_v53 = vpop.f32.mrb[6].mxu0 }
 0xf04   :  { %v1211_v58 = vrot.slane %v1206_v53, 3  ;;  %v1212_v59 = vrot.slane %v1206_v53, 4  ;;  %v1983_v55 = vpop.f32.mrb[7].mxu0 }
 0xf06   :  { %v1215_v60 = vadd.f32 %v1211_v58, %v2489_v21  ;;  %v1216_v57 = vadd.f32 %v1212_v59, %v2487_v17 }
 0xf08   :  { %2173 = vtanh.f32 %v1215_v60  ;;  %v1848_v4 = vmul.f32 -1.442695, %v1215_v60  ;;  %v1849_v6 = vmul.f32 -1.442695, %v1216_v57 }
 0xf09   :  { %2175 = vtanh.f32 %v1216_v57 }
 0xf0a   :  { %2177 = vpow2.f32 %v1848_v4 }
 0xf0b   :  { %2179 = vpow2.f32 %v1849_v6 }
 0xf12   :  { %v2174_v61 = vpop.eup %2173 }
 0xf13   :  { %v2176_v62 = vpop.eup %2175  ;;  %1244 = vrot.lane.b32.xlu0 %v2174_v61, %s2325_s23 }
 0xf14   :  { %1246 = vrot.lane.b32.xlu1 %v2176_v62, %s2325_s23  ;;  %v2178_v13 = vpop.eup %2177 }
 0xf15   :  { %v2180_v5 = vpop.eup %2179  ;;  %v1223_v7 = vadd.f32 1.0, %v2178_v13 }
 0xf16   :  { %v1224_v10 = vadd.f32 1.0, %v2180_v5 }
 0xf17   :  { %1234 = vrot.lane.b32.xlu0 %v1232_v0, %s2326_s4  ;;  %2181 = vrcp.f32 %v1223_v7 }
 0xf18   :  { %1236 = vrot.lane.b32.xlu1 %v1233_v3, %s2326_s4  ;;  %2183 = vrcp.f32 %v1224_v10 }
 0xf21   :  { %v2182_v12 = vpop.eup %2181 }
 0xf22   :  { %v2184_v8 = vpop.eup %2183 }
 0xf85   :  { %v1245_v14 = vpop.permute.xlu0 %1244 }
 0xf86   :  { %v1250_v15 = vmul.f32 %v2182_v12, %v1245_v14  ;;  %v1247_v16 = vpop.permute.xlu1 %1246 }
 0xf87   :  { %v1251_v18 = vmul.f32 %v2184_v8, %v1247_v16 }
 0xf88   :  { %1254 = vrot.lane.b32.xlu0 %v1250_v15, %s2326_s4 }
 0xf89   :  { %1256 = vrot.lane.b32.xlu1 %v1251_v18, %s2326_s4  ;;  %v1235_v11 = vpop.permute.xlu0 %1234 }
 0xf8a   :  { %v1237_v20 = vpop.permute.xlu1 %1236  ;;  %v1240_v19 = vmul.f32 %v2182_v12, %v1235_v11 }
 0xf8b   :  { %v1241_v22 = vmul.f32 %v2184_v8, %v1237_v20 }
 0xffa   :  { %v1255_v23 = vpop.permute.xlu0 %1254 }
 0xffb   :  { %v1260_v24 = vadd.f32 %v1255_v23, %v1240_v19  ;;  %v1257_v25 = vpop.permute.xlu1 %1256 }
 0xffc   :  { %v1261_v26 = vadd.f32 %v1257_v25, %v1241_v22 }
 0xffd   :  { %2185 = vtanh.f32 %v1260_v24  ;;  %v1291_v30 = vrot.slane %v1260_v24, 5  ;;  %v1468_v24 = vsel %vm1467_vm1, 1, %v2327_v38 }
 0xffe   :  { %2187 = vtanh.f32 %v1261_v26  ;;  %v1292_v31 = vrot.slane %v1261_v26, 4 }
0x1000   :  { %v1293_v32 = vsel %vm324_vm2, %v1292_v31, %v1291_v30  ;;  %v1521_v30 = vld [vmem:[#allocation8 + $0x10] sm:$0xff] }
0x1007   :  { %v2186_v27 = vpop.eup %2185 }
0x1008   :  { %v2188_v28 = vpop.eup %2187  ;;  %1266 = vrot.lane.b32.xlu0 %v2186_v27, %s2325_s23 }
0x1009   :  { %1268 = vrot.lane.b32.xlu1 %v2188_v28, %s2325_s23  ;;  %v1519_v28 = vld [vmem:[#allocation8] sm:$0xff] }
0x100c   :  { %1277 = vperm.xlu0 %2091, %v1275_v29   ;;  %v1520_v29 = vld [vmem:[#allocation8 + $0x8] sm:$0xff] }
0x100d   :  { %v2064_v31 = vpack.c.bf16 %v1520_v29, %v1519_v28  ;;  %v1706_v29 = vld [vmem:[#allocation9 + $0x10] sm:$0xff] }
0x100f   :  { %2065 = vmatpush3.bf16.msra.mxu0 %v2064_v31 }
0x1010   :  { %1294 = vrot.lane.b32.xlu0 %v1293_v32, %s2328_s18  ;;  %v2067_v32 = vpack.c.bf16 %v1522_v47, %v1521_v30  ;;  %2066 = vmatprep.subr.bf16.mxu0 %v2322_v1  ;;  %v1707_v30 = vld [vmem:[#allocation9 + $0x18] sm:$0xff] }
0x1011   :  { %v2073_v47 = vpack.c.bf16 %v1707_v30, %v1706_v29 }
0x1013   :  { %2068 = vmatpush3.bf16.msra.mxu0 %v2067_v32 }
0x107a   :  { %v1267_v33 = vpop.permute.xlu0 %1266 }
0x107b   :  { %v1272_v34 = vmul.f32 %v2182_v12, %v1267_v33  ;;  %v1269_v35 = vpop.permute.xlu1 %1268 }
0x107c   :  { %v1273_v36 = vmul.f32 %v2184_v8, %v1269_v35 }
0x107d   :  { %v1282_v37 = vrot.slane %v1272_v34, 5 }
0x107e   :  { %v1283_v39 = vrot.slane %v1273_v36, 4 }
0x1080   :  { %v1284_v40 = vsel %vm324_vm2, %v1283_v39, %v1282_v37 }
0x1081   :  { %1285 = vrot.lane.b32.xlu1 %v1284_v40, %s2326_s4 }
0x108b   :  { %v1278_v41 = vpop.permute.xlu0 %1277 }
0x108c   :  { %vm1279_vm0 = vcmp.eq.s32.totalorder %v1278_v41, 1 }
0x108f   :  { %v1295_v58 = vpop.permute.xlu0 %1294 }
0x1090   :  { %v2723_v55 = vsel %vm1279_vm0, %v1295_v58, %v2689_v9 }
0x1091   :  { %v1425_v57 = vrot.slane %v2723_v55, 2  ;;  %v1426_v2 = vrot.slane %v2723_v55, 3 }
0x10f3   :  { %v1286_v42 = vpop.permute.xlu1 %1285 }
0x10f4   :  { %v2709_v43 = vsel %vm1279_vm0, %v1286_v42, %v2673_v49  ;;  %v1298_v44 = vsel %vm1279_vm0, %v1286_v42, 0.0 }
0x10f5   :  { %v1306_v45 = vrot.slane %v1298_v44, %v2512_v63  ;;  %1993 = vmatmul.mubr.msk.f32.vlgmr.msra.gmra.mrb[6].mxu1 %vm187_vm5, %v2709_v43 }
0x10f7   :  { %v1307_v46 = vcombine.high %v1306_v45, %v1306_v45  ;;  %v1314_v48 = vrot.slane %v1306_v45, %v2512_v63 }
0x10f9   :  { %v1321_v50 = vrot.slane %v1307_v46, %v2512_v63  ;;  %1324 = vst.msk [vmem:[#allocation2 + $0x5] sm:$0x1] %vm363_vm6, %v1314_v48 }
0x10fb   :  { %1325 = vst.msk [vmem:[#allocation2 + $0xd] sm:$0x1] %vm363_vm6, %v1321_v50 }
0x11c8   :  { %v1399_v51 = vpop.f32.mrb[6].mxu1 }
0x11c9   :  { %v1404_v52 = vrot.slane %v1399_v51, 2  ;;  %v1405_v49 = vrot.slane %v1399_v51, 3  ;;  %v1994_v54 = vpop.f32.mrb[7].mxu1 }
0x11cb   :  { %v1408_v56 = vadd.f32 %v1404_v52, %v2489_v21  ;;  %v1409_v53 = vadd.f32 %v1405_v49, %v2487_v17 }
0x11cd   :  { %2189 = vtanh.f32 %v1408_v56  ;;  %v1851_v61 = vmul.f32 -1.442695, %v1408_v56  ;;  %v1852_v62 = vmul.f32 -1.442695, %v1409_v53 }
0x11ce   :  { %2191 = vtanh.f32 %v1409_v53 }
0x11cf   :  { %2193 = vpow2.f32 %v1851_v61 }
0x11d0   :  { %2195 = vpow2.f32 %v1852_v62 }
0x11d7   :  { %v2190_v59 = vpop.eup %2189 }
0x11d8   :  { %v2192_v60 = vpop.eup %2191  ;;  %1437 = vrot.lane.b32.xlu1 %v2190_v59, %s2325_s23 }
0x11d9   :  { %1439 = vrot.lane.b32.xlu0 %v2192_v60, %s2325_s23  ;;  %v2194_v0 = vpop.eup %2193 }
0x11da   :  { %v2196_v9 = vpop.eup %2195  ;;  %v1416_v3 = vadd.f32 1.0, %v2194_v0 }
0x11db   :  { %v1417_v4 = vadd.f32 1.0, %v2196_v9 }
0x11dc   :  { %1427 = vrot.lane.b32.xlu1 %v1425_v57, %s2326_s4  ;;  %2197 = vrcp.f32 %v1416_v3 }
0x11dd   :  { %1429 = vrot.lane.b32.xlu0 %v1426_v2, %s2326_s4  ;;  %2199 = vrcp.f32 %v1417_v4 }
0x11e6   :  { %v2198_v6 = vpop.eup %2197 }
0x11e7   :  { %v2200_v5 = vpop.eup %2199 }
0x124a   :  { %v1438_v13 = vpop.permute.xlu1 %1437 }
0x124b   :  { %v1440_v7 = vpop.permute.xlu0 %1439  ;;  %v1443_v10 = vmul.f32 %v2198_v6, %v1438_v13 }
0x124c   :  { %v1444_v12 = vmul.f32 %v2200_v5, %v1440_v7 }
0x124d   :  { %1447 = vrot.lane.b32.xlu1 %v1443_v10, %s2326_s4 }
0x124e   :  { %1449 = vrot.lane.b32.xlu0 %v1444_v12, %s2326_s4  ;;  %v1428_v14 = vpop.permute.xlu1 %1427 }
0x124f   :  { %v1430_v8 = vpop.permute.xlu0 %1429  ;;  %v1433_v15 = vmul.f32 %v2198_v6, %v1428_v14 }
0x1250   :  { %v1434_v16 = vmul.f32 %v2200_v5, %v1430_v8 }
0x12bf   :  { %v1448_v18 = vpop.permute.xlu1 %1447 }
0x12c0   :  { %v1450_v11 = vpop.permute.xlu0 %1449  ;;  %v1453_v20 = vadd.f32 %v1448_v18, %v1433_v15 }
0x12c1   :  { %v1454_v19 = vadd.f32 %v1450_v11, %v1434_v16  ;;  %v2221_v11 = vld [vmem:[%s2789_s1] sm:$0x3] }
0x12c2   :  { %2201 = vtanh.f32 %v1453_v20  ;;  %v1484_v26 = vrot.slane %v1453_v20, 6  ;;  %vm1660_vm4 = vcmp.gt.s32.totalorder %v2221_v11, 7 }
0x12c3   :  { %2203 = vtanh.f32 %v1454_v19  ;;  %v1485_v25 = vrot.slane %v1454_v19, 5 }
0x12c5   :  { %v1486_v27 = vsel %vm324_vm2, %v1485_v25, %v1484_v26 }
0x12cc   :  { %v2202_v22 = vpop.eup %2201 }
0x12cd   :  { %v2204_v23 = vpop.eup %2203  ;;  %1459 = vrot.lane.b32.xlu1 %v2202_v22, %s2325_s23  ;;  %v1661_v22 = vsel %vm1660_vm4, 1, %v2327_v38 }
0x12ce   :  { %1461 = vrot.lane.b32.xlu0 %v2204_v23, %s2325_s23  ;;  %v1704_v23 = vld [vmem:[#allocation9] sm:$0xff] }
0x12d1   :  { %1470 = vperm.xlu1 %2092, %v1468_v24   ;;  %v1705_v24 = vld [vmem:[#allocation9 + $0x8] sm:$0xff] }
0x12d2   :  { %v2069_v25 = vpack.c.bf16 %v1705_v24, %v1704_v23 }
0x12d4   :  { %2070 = vmatprep.subr.bf16.mxu1 %v2069_v25 }
0x12d5   :  { %1487 = vrot.lane.b32.xlu1 %v1486_v27, %s2328_s18  ;;  %2072 = vmatpush3.bf16.msra.mxu1 %v2069_v25 }
0x12d6   :  { %2074 = vmatprep.subr.bf16.mxu1 %v2073_v47 }
0x12d9   :  { %2076 = vmatpush3.bf16.msra.mxu1 %v2073_v47 }
0x133f   :  { %v1460_v33 = vpop.permute.xlu1 %1459 }
0x1340   :  { %v1462_v34 = vpop.permute.xlu0 %1461  ;;  %v1465_v35 = vmul.f32 %v2198_v6, %v1460_v33 }
0x1341   :  { %v1466_v36 = vmul.f32 %v2200_v5, %v1462_v34 }
0x1342   :  { %v1475_v37 = vrot.slane %v1465_v35, 6 }
0x1343   :  { %v1476_v39 = vrot.slane %v1466_v36, 5 }
0x1345   :  { %v1477_v40 = vsel %vm324_vm2, %v1476_v39, %v1475_v37 }
0x1346   :  { %1478 = vrot.lane.b32.xlu0 %v1477_v40, %s2326_s4 }
0x1350   :  { %v1471_v41 = vpop.permute.xlu1 %1470 }
0x1351   :  { %vm1472_vm3 = vcmp.eq.s32.totalorder %v1471_v41, 1 }
0x1354   :  { %v1488_v53 = vpop.permute.xlu1 %1487 }
0x1355   :  { %v1490_v59 = vsel %vm1472_vm3, %v1488_v53, %v2723_v55 }
0x1356   :  { %v1618_v57 = vrot.slane %v1490_v59, 1  ;;  %v1619_v2 = vrot.slane %v1490_v59, 2 }
0x13b8   :  { %v1479_v42 = vpop.permute.xlu0 %1478 }
0x13b9   :  { %v1481_v44 = vsel %vm1472_vm3, %v1479_v42, %v2709_v43  ;;  %v1491_v45 = vsel %vm1472_vm3, %v1479_v42, 0.0 }
0x13ba   :  { %v1499_v1 = vrot.slane %v1491_v45, %v2512_v63  ;;  %2004 = vmatmul.mubr.msk.f32.vlgmr.msra.gmra.mrb[8].mxu0 %vm187_vm5, %v1481_v44  ;;  %v1856_v45 = vld [vmem:[%s2794_s6] ss:$0 sm:$0xff] }
0x13bc   :  { %v1500_v46 = vcombine.high %v1499_v1, %v1499_v1  ;;  %v1507_v48 = vrot.slane %v1499_v1, %v2512_v63 }
0x13be   :  { %v1514_v50 = vrot.slane %v1500_v46, %v2512_v63  ;;  %1517 = vst.msk [vmem:[#allocation2 + $0x6] sm:$0x1] %vm363_vm6, %v1507_v48 }
0x13c0   :  { %1518 = vst.msk [vmem:[#allocation2 + $0xe] sm:$0x1] %vm363_vm6, %v1514_v50 }
0x148d   :  { %v1592_v51 = vpop.f32.mrb[8].mxu0 }
0x148e   :  { %v1597_v52 = vrot.slane %v1592_v51, 1  ;;  %v1598_v49 = vrot.slane %v1592_v51, 2  ;;  %v2005_v54 = vpop.f32.mrb[9].mxu0 }
0x1490   :  { %v1601_v43 = vadd.f32 %v1597_v52, %v2489_v21  ;;  %v1602_v56 = vadd.f32 %v1598_v49, %v2487_v17 }
0x1492   :  { %2205 = vtanh.f32 %v1601_v43  ;;  %v1854_v21 = vmul.f32 -1.442695, %v1601_v43  ;;  %v1855_v17 = vmul.f32 -1.442695, %v1602_v56  ;;  %v1860_v43 = vld [vmem:[#allocation3] ss:$0 sm:$0xff] }
0x1493   :  { %2207 = vtanh.f32 %v1602_v56 }
0x1494   :  { %2209 = vpow2.f32 %v1854_v21 }
0x1495   :  { %2211 = vpow2.f32 %v1855_v17 }
0x149c   :  { %v2206_v58 = vpop.eup %2205 }
0x149d   :  { %v2208_v60 = vpop.eup %2207  ;;  %1630 = vrot.lane.b32.xlu0 %v2206_v58, %s2325_s23 }
0x149e   :  { %1632 = vrot.lane.b32.xlu1 %v2208_v60, %s2325_s23  ;;  %v2210_v61 = vpop.eup %2209 }
0x149f   :  { %v2212_v62 = vpop.eup %2211  ;;  %v1609_v0 = vadd.f32 1.0, %v2210_v61 }
0x14a0   :  { %v1610_v9 = vadd.f32 1.0, %v2212_v62 }
0x14a1   :  { %1620 = vrot.lane.b32.xlu0 %v1618_v57, %s2326_s4  ;;  %2213 = vrcp.f32 %v1609_v0 }
0x14a2   :  { %1622 = vrot.lane.b32.xlu1 %v1619_v2, %s2326_s4  ;;  %2215 = vrcp.f32 %v1610_v9 }
0x14ab   :  { %v2214_v55 = vpop.eup %2213 }
0x14ac   :  { %v2216_v4 = vpop.eup %2215 }
0x150f   :  { %v1631_v3 = vpop.permute.xlu0 %1630 }
0x1510   :  { %v1636_v6 = vmul.f32 %v2214_v55, %v1631_v3  ;;  %v1633_v13 = vpop.permute.xlu1 %1632 }
0x1511   :  { %v1637_v5 = vmul.f32 %v2216_v4, %v1633_v13 }
0x1512   :  { %1640 = vrot.lane.b32.xlu0 %v1636_v6, %s2326_s4 }
0x1513   :  { %1642 = vrot.lane.b32.xlu1 %v1637_v5, %s2326_s4  ;;  %v1621_v7 = vpop.permute.xlu0 %1620 }
0x1514   :  { %v1623_v10 = vpop.permute.xlu1 %1622  ;;  %v1626_v12 = vmul.f32 %v2214_v55, %v1621_v7 }
0x1515   :  { %v1627_v14 = vmul.f32 %v2216_v4, %v1623_v10 }
0x1584   :  { %v1641_v8 = vpop.permute.xlu0 %1640 }
0x1585   :  { %v1646_v15 = vadd.f32 %v1641_v8, %v1626_v12  ;;  %v1643_v16 = vpop.permute.xlu1 %1642 }
0x1586   :  { %v1647_v18 = vadd.f32 %v1643_v16, %v1627_v14 }
0x1587   :  { %2217 = vtanh.f32 %v1646_v15 }
0x1588   :  { %2219 = vtanh.f32 %v1647_v18 }
0x1591   :  { %v2218_v20 = vpop.eup %2217 }
0x1592   :  { %v2220_v19 = vpop.eup %2219  ;;  %1652 = vrot.lane.b32.xlu0 %v2218_v20, %s2325_s23 }
0x1593   :  { %1654 = vrot.lane.b32.xlu1 %v2220_v19, %s2325_s23 }
0x1596   :  { %1663 = vperm.xlu0 %2091, %v1661_v22  }
0x1604   :  { %v1653_v26 = vpop.permute.xlu0 %1652 }
0x1605   :  { %v1658_v27 = vmul.f32 %v2214_v55, %v1653_v26  ;;  %v1655_v28 = vpop.permute.xlu1 %1654 }
0x1606   :  { %v1659_v31 = vmul.f32 %v2216_v4, %v1655_v28 }
0x1607   :  { %v1668_v32 = vrot.slane %v1658_v27, 7 }
0x1608   :  { %v1669_v33 = vrot.slane %v1659_v31, 6 }
0x160a   :  { %v1670_v34 = vsel %vm324_vm2, %v1669_v33, %v1668_v32  ;;  %vm1820_vm2 = vcmask 7168  }
0x160b   :  { %1671 = vrot.lane.b32.xlu1 %v1670_v34, %s2326_s4 }
0x1615   :  { %v1664_v38 = vpop.permute.xlu0 %1663 }
0x1616   :  { %vm1665_vm7 = vcmp.eq.s32.totalorder %v1664_v38, 1 }
0x167d   :  { %v1672_v35 = vpop.permute.xlu1 %1671 }
0x167e   :  { %v1674_v36 = vsel %vm1665_vm7, %v1672_v35, 0.0 }
0x167f   :  { %v1682_v37 = vrot.slane %v1674_v36, %v2512_v63 }
0x1681   :  { %v1683_v39 = vcombine.high %v1682_v37, %v1682_v37  ;;  %v1690_v40 = vrot.slane %v1682_v37, %v2512_v63 }
0x1683   :  { %v1697_v41 = vrot.slane %v1683_v39, %v2512_v63  ;;  %1700 = vst.msk [vmem:[#allocation2 + $0x7] sm:$0x1] %vm363_vm6, %v1690_v40  ;;  %v1859_v63 = vld [vmem:[%s2795_s7] ss:$0 sm:$0xff] }
0x1685   :  { %1701 = vst.msk [vmem:[#allocation2 + $0xf] sm:$0x1] %vm363_vm6, %v1697_v41 }
0x168a   :  { %v1702_v42 = vld [vmem:[#allocation2] sm:$0xff] }
0x168b   :  { %2014 = vmatprep.mubr.msk.f32.mxu1 %vm187_vm5, %v1702_v42 }
0x168c   :  { %v1703_v44 = vld [vmem:[#allocation2 + $0x8] sm:$0xff] }
0x168d   :  { %2015 = vmatmul.mubr.msk.f32.vlgmr.msra.gmra.mrb[8].mxu1 %vm187_vm5, %v1703_v44 }
0x1760   :  { %v2016_v1 = vpop.f32.mrb[8].mxu1 }
0x1761   :  { %v1793_v46 = vadd.f32 %v2016_v1, %v1856_v45  ;;  %v1787_v48 = vpop.f32.mrb[9].mxu1 }
0x1762   :  { %v1788_v50 = vadd.f32 %v1856_v45, %v1787_v48 }
0x1763   :  { %v1797_v51 = vmax.f32 %v1793_v46, 0.0 }
0x1764   :  { %v1796_v52 = vmax.f32 %v1788_v50, 0.0 }
0x1765   :  { %v1806_v49 = vmul.f32 %v1859_v63, %v1797_v51 }
0x1766   :  { %v1805_v54 = vmul.f32 %v1859_v63, %v1796_v52 }
0x1767   :  { %1809 = vadd.xlane.f32.xlu1 %v1806_v49 }
0x1768   :  { %1807 = vadd.xlane.f32.xlu0 %v1805_v54 }
0x17f4   :  { %v1810_v56 = vpop.xlane.xlu1 %1809 }
0x17f5   :  { %v1819_v53 = vadd.f32 %v1860_v43, %v1810_v56  ;;  %v1808_v58 = vpop.xlane.xlu0 %1807 }
0x17f6   :  { %v1818_v59 = vadd.f32 %v1860_v43, %v1808_v58 }
0x17f7   :  { %1822 = vst.msk [vmem:[%s2797_s9 + $0x8] sm:$0xff] %vm1820_vm2, %v1819_v53 }
0x17f8   :  { %1821 = vst.msk [vmem:[%s2797_s9] sm:$0xff] %vm1820_vm2, %v1818_v59 }
0x17f9   :  { %1827 = vsyncpa [#allocation5], 1 }
0x17fa   :  { %1828 = vsyncpa [#allocation7], 1 }
0x17fb   :  { %1829 = vsyncpa [#allocation10], 1 }

</bundles_post_ra>
